<compile_context>
chip_gen: v5e
topology: v5e:2x2
jax: 0.10.0
libtpu: 0.0.40
codegen_flags: <defaults>
</compile_context>

<pallas_src>
import math
import jax
import jax.numpy as jnp
from jax.experimental import pallas as pl
from jax.experimental.pallas import tpu as pltpu


SUBLANES = 8  # f32 sublane height; batch is padded to a multiple of this


# ----------------------------- Pallas kernel --------------------------------

def make_fused_lstm_fc_kernel(num_layers, T, BP, H, V):
    """Builds a kernel with refs:
       [tok (T*BP,1) i32, emb (V,E)] + [wih_t (D,4H), whh_t (H,4H), b (1,4H)] * L
       + [fc_wt (H,C), fc_b (1,C)] + [o (BP,C)]
       + scratch [xg_scr (T,BP,4H), hseq_scr (T,BP,H)]
    """

    def kernel(*refs):
        tok_ref, emb_ref = refs[0], refs[1]
        layer_refs = refs[2:2 + 3 * num_layers]
        fcw_ref = refs[2 + 3 * num_layers]
        fcb_ref = refs[3 + 3 * num_layers]
        o_ref = refs[4 + 3 * num_layers]
        xg_scr = refs[5 + 3 * num_layers]      # (T, BP, 4H) hoisted gates (VMEM)
        hseq_scr = refs[6 + 3 * num_layers]    # (T, BP, H) inter-layer sequence (VMEM)

        # ---- embedding gather fused as a one-hot MXU matmul (prologue) ------
        tok = tok_ref[...]                                          # (T*BP, 1) i32
        onehot = (jax.lax.broadcasted_iota(jnp.int32, (T * BP, V), 1)
                  == tok).astype(jnp.float32)                       # (T*BP, V)
        x0 = jnp.dot(onehot, emb_ref[...],
                     preferred_element_type=jnp.float32)            # (T*BP, E)

        # ---- hoisted lane constants for single-tanh gate activation ---------
        # PyTorch gate order (i, f, g, o): sigmoid on i/f/o lanes, tanh on g lanes.
        # sigmoid(x) = 0.5*tanh(0.5*x) + 0.5  -> one EUP pass over the full 4H block.
        lane = jax.lax.broadcasted_iota(jnp.int32, (BP, 4 * H), 1)
        g_mask = (lane >= 2 * H) & (lane < 3 * H)
        pre = jnp.where(g_mask, 1.0, 0.5).astype(jnp.float32)       # gate pre-scale
        shift = (1.0 - pre).astype(jnp.float32)                     # 0 for g, 0.5 else

        def activate(gates):
            th = jnp.tanh(gates * pre)
            return th * pre + shift

        h = jnp.zeros((BP, H), jnp.float32)
        for l in range(num_layers):
            wih_ref, whh_ref, b_ref = layer_refs[3 * l:3 * l + 3]
            last_layer = (l == num_layers - 1)

            # Layer input sequence: one-hot-gathered embeddings for layer 0,
            # previous layer's VMEM-resident hidden sequence afterwards.
            # (hseq_scr is fully read into a value BEFORE this layer overwrites it.)
            seq = x0 if l == 0 else hseq_scr[...].reshape(T * BP, H)

            # Hoisted input projection for ALL time steps: one MXU op, off the serial
            # path; result stored time-major so per-step access is a leading-axis index.
            xg = (jnp.dot(seq, wih_ref[...], preferred_element_type=jnp.float32)
                  + b_ref[...])                                     # (T*BP, 4H)
            xg_scr[...] = xg.reshape(T, BP, 4 * H)

            whh = whh_ref[...]                                      # (H, 4H)

            # ---- t == 0: h == c == 0 -> skip recurrent matmul and f*c term ----
            act = activate(xg_scr[0])
            i_g = act[:, 0 * H:1 * H]
            g_g = act[:, 2 * H:3 * H]
            o_g = act[:, 3 * H:4 * H]
            c = i_g * g_g
            h = o_g * jnp.tanh(c)
            if not last_layer:
                hseq_scr[0] = h

            # ---- serial recurrence; only h @ W_hh on the critical path --------
            # TODO(synk): for T > ~16, switch to lax.fori_loop (h/c carried in small
            #             VMEM scratch) to bound live ranges and compile time.
            # TODO(synk): hold W_hh resident in the MXU across the T steps via
            #             pltpu.matmul_push_rhs / matmul_acc_lhs / matmul_pop.
            for t in range(1, T):
                gates = xg_scr[t] + jnp.dot(h, whh,
                                            preferred_element_type=jnp.float32)
                act = activate(gates)
                i_g = act[:, 0 * H:1 * H]
                f_g = act[:, 1 * H:2 * H]
                g_g = act[:, 2 * H:3 * H]
                o_g = act[:, 3 * H:4 * H]
                c = f_g * c + i_g * g_g
                h = o_g * jnp.tanh(c)
                if not last_layer:
                    hseq_scr[t] = h

        # Final FC + sigmoid on the LAST time step only (out[:, -1, :]); only this
        # tiny (BP, C) block goes back to HBM.
        # TODO(synk): pad the fc lane dim to a multiple of 128 if num_classes grows.
        z = jnp.dot(h, fcw_ref[...], preferred_element_type=jnp.float32) + fcb_ref[...]
        o_ref[...] = jax.nn.sigmoid(z)

    return kernel


# ------------------------------ wrappers -------------------------------------

def pack_kernel_params(params):
    """Pre-transpose weights / combine biases ONCE (outside the jitted forward)."""
    lstm = []
    for (w_ih, w_hh, b_ih, b_hh) in params["lstm"]:
        H4 = w_ih.shape[0]
        lstm.append((jnp.transpose(w_ih),                  # (D_in, 4H)
                     jnp.transpose(w_hh),                  # (H, 4H)
                     (b_ih + b_hh).reshape(1, H4)))        # (1, 4H)
    # TODO(synk): at realistic H, cast resident W_ih/W_hh/fc (and the sequence
    # operands of the hoisted projections) to bf16 for MXU peak rate and half the
    # VMEM footprint; keep gate math / h / c in f32 (v5e VPU/EUP have no bf16) and
    # loosen the f32 allclose tolerance accordingly.
    return {
        "embedding": params["embedding"].astype(jnp.float32),
        "lstm": lstm,
        "fc_wt": jnp.transpose(params["fc_w"]),            # (H, C)
        "fc_b": params["fc_b"].reshape(1, -1),             # (1, C)
    }


def model_forward(tokens, kparams):
    """tokens: (B, T) int32 -> (B, num_classes) f32. One fused pallas_call."""
    B, T = tokens.shape
    emb = kparams["embedding"]
    V = emb.shape[0]
    num_layers = len(kparams["lstm"])
    H = kparams["lstm"][0][1].shape[0]
    C = kparams["fc_wt"].shape[1]

    BP = max(SUBLANES, ((B + SUBLANES - 1) // SUBLANES) * SUBLANES)

    # Time-major tokens, batch padded to the 8-sublane height.  Padded rows use
    # token 0; the LSTM never mixes batch rows and the padding is sliced off below.
    tok_tb = jnp.zeros((T, BP), jnp.int32).at[:, :B].set(tokens.T.astype(jnp.int32))
    tok_flat = tok_tb.reshape(T * BP, 1)

    ins = [tok_flat, emb]
    for (wih_t, whh_t, b) in kparams["lstm"]:
        ins += [wih_t, whh_t, b]
    ins += [kparams["fc_wt"], kparams["fc_b"]]

    kernel = make_fused_lstm_fc_kernel(num_layers, T, BP, H, V)
    vmem = lambda: pl.BlockSpec(memory_space=pltpu.MemorySpace.VMEM)

    # TODO(synk): on v7x add a batch-parallel grid axis (2 TensorCores) with weight
    # BlockSpecs mapping every batch tile to block 0, and tile the time axis /
    # set pltpu.CompilerParams(vmem_limit_bytes=...) once T*B*H is large enough to
    # exceed the 32 MiB default scoped VMEM.
    out = pl.pallas_call(
        kernel,
        out_shape=jax.ShapeDtypeStruct((BP, C), jnp.float32),
        in_specs=[vmem() for _ in ins],
        out_specs=vmem(),
        scratch_shapes=[pltpu.VMEM((T, BP, 4 * H), jnp.float32),
                        pltpu.VMEM((T, BP, H), jnp.float32)],
    )(*ins)
    return out[:B]


# ------------------------- pure-JAX reference --------------------------------

def reference_forward(tokens, params):
    x = jnp.take(params["embedding"], tokens, axis=0)              # (B, T, E)
    h = x.astype(jnp.float32)
    B = h.shape[0]
    for (w_ih, w_hh, b_ih, b_hh) in params["lstm"]:
        H = w_hh.shape[1]

        def step(carry, xt):
            hp, cp = carry
            g = xt @ w_ih.T + b_ih + hp @ w_hh.T + b_hh
            i, f, gg, o = jnp.split(g, 4, axis=-1)
            i = jax.nn.sigmoid(i); f = jax.nn.sigmoid(f)
            gg = jnp.tanh(gg); o = jax.nn.sigmoid(o)
            c = f * cp + i * gg
            hn = o * jnp.tanh(c)
            return (hn, c), hn

        init = (jnp.zeros((B, H), jnp.float32), jnp.zeros((B, H), jnp.float32))
        _, ys = jax.lax.scan(step, init, jnp.transpose(h, (1, 0, 2)))
        h = jnp.transpose(ys, (1, 0, 2))
    last = h[:, -1, :]
    return jax.nn.sigmoid(last @ params["fc_w"].T + params["fc_b"])


# ------------------------------- main -----------------------------------------

if __name__ == "__main__":
    # Module hyper-parameters (sequence_length=1 so fc in_features == hidden_size,
    # matching the reference forward's out[:, -1, :]).
    input_size = 32
    hidden_size = 32
    num_layers = 2
    num_classes = 8
    sequence_length = 1
    vocab_size = 50

    B, T = 2, 8   # actual batch / token-sequence length of the input

    key = jax.random.PRNGKey(0)
    keys = jax.random.split(key, 3 + 4 * num_layers)

    k_lstm = 1.0 / math.sqrt(hidden_size)
    lstm_params = []
    for l in range(num_layers):
        d_in = input_size if l == 0 else hidden_size
        kw = keys[3 + 4 * l: 3 + 4 * (l + 1)]
        w_ih = jax.random.uniform(kw[0], (4 * hidden_size, d_in), jnp.float32, -k_lstm, k_lstm)
        w_hh = jax.random.uniform(kw[1], (4 * hidden_size, hidden_size), jnp.float32, -k_lstm, k_lstm)
        b_ih = jax.random.uniform(kw[2], (4 * hidden_size,), jnp.float32, -k_lstm, k_lstm)
        b_hh = jax.random.uniform(kw[3], (4 * hidden_size,), jnp.float32, -k_lstm, k_lstm)
        lstm_params.append((w_ih, w_hh, b_ih, b_hh))

    fc_in = hidden_size * sequence_length
    k_fc = 1.0 / math.sqrt(fc_in)
    params = {
        "embedding": jax.random.normal(keys[0], (vocab_size, input_size), jnp.float32),
        "lstm": lstm_params,
        "fc_w": jax.random.uniform(keys[1], (num_classes, fc_in), jnp.float32, -k_fc, k_fc),
        "fc_b": jax.random.uniform(keys[2], (num_classes,), jnp.float32, -k_fc, k_fc),
    }
    # NOTE: rnn / fc1 / fc2 / fc3 / dropout are unused in the reference forward.

    kparams = pack_kernel_params(params)   # pre-transposed once, outside jit

    tokens = jax.random.randint(jax.random.PRNGKey(42), (B, T), 0, vocab_size, dtype=jnp.int32)

    out = jax.jit(model_forward)(tokens, kparams)
    out = jax.block_until_ready(out)

    ref = reference_forward(tokens, params)
    assert out.shape == (B, num_classes), out.shape
    assert jnp.allclose(out, ref, rtol=1e-5, atol=2e-5), (out, ref)

    print("KERNEL_OK")
</pallas_src>

<mosaic_0001>
module attributes {stable_mosaic.version = 11 : i64} {
  func.func @kernel(%arg0: memref<64x1xi32, #tpu.memory_space<vmem>>, %arg1: memref<50x32xf32, #tpu.memory_space<vmem>>, %arg2: memref<32x128xf32, #tpu.memory_space<vmem>>, %arg3: memref<32x128xf32, #tpu.memory_space<vmem>>, %arg4: memref<1x128xf32, #tpu.memory_space<vmem>>, %arg5: memref<32x128xf32, #tpu.memory_space<vmem>>, %arg6: memref<32x128xf32, #tpu.memory_space<vmem>>, %arg7: memref<1x128xf32, #tpu.memory_space<vmem>>, %arg8: memref<32x8xf32, #tpu.memory_space<vmem>>, %arg9: memref<1x8xf32, #tpu.memory_space<vmem>>, %arg10: memref<8x8xf32, #tpu.memory_space<vmem>>, %arg11: memref<8x8x128xf32, #tpu.memory_space<vmem>>, %arg12: memref<8x8x32xf32, #tpu.memory_space<vmem>>) attributes {dimension_semantics = [], scalar_prefetch = 0 : i64, scratch_operands = 2 : i64, tpu.core_type = #tpu.core_type<tc>} {
    %c0 = arith.constant 0 : index
    %c0_0 = arith.constant 0 : index
    %0 = vector.load %arg0[%c0, %c0_0] : memref<64x1xi32, #tpu.memory_space<vmem>>, vector<64x1xi32>
    %1 = tpu.iota {dimensions = array<i32: 1>} : vector<64x50xi32>
    %2 = vector.broadcast %0 : vector<64x1xi32> to vector<64x50xi32>
    %3 = arith.cmpi eq, %1, %2 : vector<64x50xi32>
    %4 = arith.extui %3 : vector<64x50xi1> to vector<64x50xi32>
    %5 = arith.sitofp %4 : vector<64x50xi32> to vector<64x50xf32>
    %c0_1 = arith.constant 0 : index
    %c0_2 = arith.constant 0 : index
    %6 = vector.load %arg1[%c0_1, %c0_2] : memref<50x32xf32, #tpu.memory_space<vmem>>, vector<50x32xf32>
    %cst = arith.constant dense<0.000000e+00> : vector<64x32xf32>
    %7 = tpu.matmul %5, %6, %cst {dimension_numbers = #tpu.dot_dimension_numbers<[1], [0], [0], [1], [0, 0, 1, 1], [], []>} : vector<64x50xf32>, vector<50x32xf32>, vector<64x32xf32> -> vector<64x32xf32>
    %8 = tpu.iota {dimensions = array<i32: 1>} : vector<8x128xi32>
    %c64_i32 = arith.constant 64 : i32
    %9 = vector.broadcast %c64_i32 : i32 to vector<8x128xi32>
    %10 = arith.cmpi sge, %8, %9 : vector<8x128xi32>
    %c96_i32 = arith.constant 96 : i32
    %11 = vector.broadcast %c96_i32 : i32 to vector<8x128xi32>
    %12 = arith.cmpi slt, %8, %11 : vector<8x128xi32>
    %13 = arith.andi %10, %12 : vector<8x128xi1>
    %cst_3 = arith.constant 1.000000e+00 : f32
    %cst_4 = arith.constant 5.000000e-01 : f32
    %14 = vector.broadcast %cst_3 : f32 to vector<8x128xf32>
    %15 = vector.broadcast %cst_4 : f32 to vector<8x128xf32>
    %16 = arith.select %13, %14, %15 : vector<8x128xi1>, vector<8x128xf32>
    %cst_5 = arith.constant 1.000000e+00 : f32
    %17 = vector.broadcast %cst_5 : f32 to vector<8x128xf32>
    %18 = arith.subf %17, %16 : vector<8x128xf32>
    %c0_6 = arith.constant 0 : index
    %c0_7 = arith.constant 0 : index
    %19 = vector.load %arg2[%c0_6, %c0_7] : memref<32x128xf32, #tpu.memory_space<vmem>>, vector<32x128xf32>
    %cst_8 = arith.constant dense<0.000000e+00> : vector<64x128xf32>
    %20 = tpu.matmul %7, %19, %cst_8 {dimension_numbers = #tpu.dot_dimension_numbers<[1], [0], [0], [1], [0, 0, 1, 1], [], []>} : vector<64x32xf32>, vector<32x128xf32>, vector<64x128xf32> -> vector<64x128xf32>
    %c0_9 = arith.constant 0 : index
    %c0_10 = arith.constant 0 : index
    %21 = vector.load %arg4[%c0_9, %c0_10] : memref<1x128xf32, #tpu.memory_space<vmem>>, vector<1x128xf32>
    %22 = vector.broadcast %21 : vector<1x128xf32> to vector<64x128xf32>
    %23 = arith.addf %20, %22 : vector<64x128xf32>
    %24 = vector.shape_cast %23 : vector<64x128xf32> to vector<8x8x128xf32>
    %c0_11 = arith.constant 0 : index
    %c0_12 = arith.constant 0 : index
    %c0_13 = arith.constant 0 : index
    %25 = vector.load %arg11[%c0_11, %c0_12, %c0_13] : memref<8x8x128xf32, #tpu.memory_space<vmem>>, vector<8x8x128xf32>
    tpu.vector_store %arg11[%c0_11, %c0_12, %c0_13], %24 {strides = array<i32>} : memref<8x8x128xf32, #tpu.memory_space<vmem>>, vector<8x8x128xf32>,
    %c0_14 = arith.constant 0 : index
    %c0_15 = arith.constant 0 : index
    %26 = vector.load %arg3[%c0_14, %c0_15] : memref<32x128xf32, #tpu.memory_space<vmem>>, vector<32x128xf32>
    %c0_16 = arith.constant 0 : index
    %c0_17 = arith.constant 0 : index
    %c0_18 = arith.constant 0 : index
    %27 = vector.load %arg11[%c0_16, %c0_17, %c0_18] : memref<8x8x128xf32, #tpu.memory_space<vmem>>, vector<1x8x128xf32>
    %28 = vector.shape_cast %27 : vector<1x8x128xf32> to vector<8x128xf32>
    %29 = arith.mulf %28, %16 : vector<8x128xf32>
    %30 = math.tanh %29 : vector<8x128xf32>
    %31 = arith.mulf %30, %16 : vector<8x128xf32>
    %32 = arith.addf %31, %18 : vector<8x128xf32>
    %33 = vector.extract_strided_slice %32 {offsets = [0, 0], sizes = [8, 32], strides = [1, 1]} : vector<8x128xf32> to vector<8x32xf32>
    %34 = vector.extract_strided_slice %32 {offsets = [0, 64], sizes = [8, 32], strides = [1, 1]} : vector<8x128xf32> to vector<8x32xf32>
    %35 = vector.extract_strided_slice %32 {offsets = [0, 96], sizes = [8, 32], strides = [1, 1]} : vector<8x128xf32> to vector<8x32xf32>
    %36 = arith.mulf %33, %34 : vector<8x32xf32>
    %37 = math.tanh %36 : vector<8x32xf32>
    %38 = arith.mulf %35, %37 : vector<8x32xf32>
    %c0_19 = arith.constant 0 : index
    %c0_20 = arith.constant 0 : index
    %c0_21 = arith.constant 0 : index
    %39 = vector.load %arg12[%c0_19, %c0_20, %c0_21] : memref<8x8x32xf32, #tpu.memory_space<vmem>>, vector<1x8x32xf32>
    %40 = vector.shape_cast %39 : vector<1x8x32xf32> to vector<8x32xf32>
    %41 = vector.shape_cast %38 : vector<8x32xf32> to vector<1x8x32xf32>
    tpu.vector_store %arg12[%c0_19, %c0_20, %c0_21], %41 {strides = array<i32>} : memref<8x8x32xf32, #tpu.memory_space<vmem>>, vector<1x8x32xf32>,
    %c1 = arith.constant 1 : index
    %c0_22 = arith.constant 0 : index
    %c0_23 = arith.constant 0 : index
    %42 = vector.load %arg11[%c1, %c0_22, %c0_23] : memref<8x8x128xf32, #tpu.memory_space<vmem>>, vector<1x8x128xf32>
    %43 = vector.shape_cast %42 : vector<1x8x128xf32> to vector<8x128xf32>
    %cst_24 = arith.constant dense<0.000000e+00> : vector<8x128xf32>
    %44 = tpu.matmul %38, %26, %cst_24 {dimension_numbers = #tpu.dot_dimension_numbers<[1], [0], [0], [1], [0, 0, 1, 1], [], []>} : vector<8x32xf32>, vector<32x128xf32>, vector<8x128xf32> -> vector<8x128xf32>
    %45 = arith.addf %43, %44 : vector<8x128xf32>
    %46 = arith.mulf %45, %16 : vector<8x128xf32>
    %47 = math.tanh %46 : vector<8x128xf32>
    %48 = arith.mulf %47, %16 : vector<8x128xf32>
    %49 = arith.addf %48, %18 : vector<8x128xf32>
    %50 = vector.extract_strided_slice %49 {offsets = [0, 0], sizes = [8, 32], strides = [1, 1]} : vector<8x128xf32> to vector<8x32xf32>
    %51 = vector.extract_strided_slice %49 {offsets = [0, 32], sizes = [8, 32], strides = [1, 1]} : vector<8x128xf32> to vector<8x32xf32>
    %52 = vector.extract_strided_slice %49 {offsets = [0, 64], sizes = [8, 32], strides = [1, 1]} : vector<8x128xf32> to vector<8x32xf32>
    %53 = vector.extract_strided_slice %49 {offsets = [0, 96], sizes = [8, 32], strides = [1, 1]} : vector<8x128xf32> to vector<8x32xf32>
    %54 = arith.mulf %51, %36 : vector<8x32xf32>
    %55 = arith.mulf %50, %52 : vector<8x32xf32>
    %56 = arith.addf %54, %55 : vector<8x32xf32>
    %57 = math.tanh %56 : vector<8x32xf32>
    %58 = arith.mulf %53, %57 : vector<8x32xf32>
    %c1_25 = arith.constant 1 : index
    %c0_26 = arith.constant 0 : index
    %c0_27 = arith.constant 0 : index
    %59 = vector.load %arg12[%c1_25, %c0_26, %c0_27] : memref<8x8x32xf32, #tpu.memory_space<vmem>>, vector<1x8x32xf32>
    %60 = vector.shape_cast %59 : vector<1x8x32xf32> to vector<8x32xf32>
    %61 = vector.shape_cast %58 : vector<8x32xf32> to vector<1x8x32xf32>
    tpu.vector_store %arg12[%c1_25, %c0_26, %c0_27], %61 {strides = array<i32>} : memref<8x8x32xf32, #tpu.memory_space<vmem>>, vector<1x8x32xf32>,
    %c2 = arith.constant 2 : index
    %c0_28 = arith.constant 0 : index
    %c0_29 = arith.constant 0 : index
    %62 = vector.load %arg11[%c2, %c0_28, %c0_29] : memref<8x8x128xf32, #tpu.memory_space<vmem>>, vector<1x8x128xf32>
    %63 = vector.shape_cast %62 : vector<1x8x128xf32> to vector<8x128xf32>
    %cst_30 = arith.constant dense<0.000000e+00> : vector<8x128xf32>
    %64 = tpu.matmul %58, %26, %cst_30 {dimension_numbers = #tpu.dot_dimension_numbers<[1], [0], [0], [1], [0, 0, 1, 1], [], []>} : vector<8x32xf32>, vector<32x128xf32>, vector<8x128xf32> -> vector<8x128xf32>
    %65 = arith.addf %63, %64 : vector<8x128xf32>
    %66 = arith.mulf %65, %16 : vector<8x128xf32>
    %67 = math.tanh %66 : vector<8x128xf32>
    %68 = arith.mulf %67, %16 : vector<8x128xf32>
    %69 = arith.addf %68, %18 : vector<8x128xf32>
    %70 = vector.extract_strided_slice %69 {offsets = [0, 0], sizes = [8, 32], strides = [1, 1]} : vector<8x128xf32> to vector<8x32xf32>
    %71 = vector.extract_strided_slice %69 {offsets = [0, 32], sizes = [8, 32], strides = [1, 1]} : vector<8x128xf32> to vector<8x32xf32>
    %72 = vector.extract_strided_slice %69 {offsets = [0, 64], sizes = [8, 32], strides = [1, 1]} : vector<8x128xf32> to vector<8x32xf32>
    %73 = vector.extract_strided_slice %69 {offsets = [0, 96], sizes = [8, 32], strides = [1, 1]} : vector<8x128xf32> to vector<8x32xf32>
    %74 = arith.mulf %71, %56 : vector<8x32xf32>
    %75 = arith.mulf %70, %72 : vector<8x32xf32>
    %76 = arith.addf %74, %75 : vector<8x32xf32>
    %77 = math.tanh %76 : vector<8x32xf32>
    %78 = arith.mulf %73, %77 : vector<8x32xf32>
    %c2_31 = arith.constant 2 : index
    %c0_32 = arith.constant 0 : index
    %c0_33 = arith.constant 0 : index
    %79 = vector.load %arg12[%c2_31, %c0_32, %c0_33] : memref<8x8x32xf32, #tpu.memory_space<vmem>>, vector<1x8x32xf32>
    %80 = vector.shape_cast %79 : vector<1x8x32xf32> to vector<8x32xf32>
    %81 = vector.shape_cast %78 : vector<8x32xf32> to vector<1x8x32xf32>
    tpu.vector_store %arg12[%c2_31, %c0_32, %c0_33], %81 {strides = array<i32>} : memref<8x8x32xf32, #tpu.memory_space<vmem>>, vector<1x8x32xf32>,
    %c3 = arith.constant 3 : index
    %c0_34 = arith.constant 0 : index
    %c0_35 = arith.constant 0 : index
    %82 = vector.load %arg11[%c3, %c0_34, %c0_35] : memref<8x8x128xf32, #tpu.memory_space<vmem>>, vector<1x8x128xf32>
    %83 = vector.shape_cast %82 : vector<1x8x128xf32> to vector<8x128xf32>
    %cst_36 = arith.constant dense<0.000000e+00> : vector<8x128xf32>
    %84 = tpu.matmul %78, %26, %cst_36 {dimension_numbers = #tpu.dot_dimension_numbers<[1], [0], [0], [1], [0, 0, 1, 1], [], []>} : vector<8x32xf32>, vector<32x128xf32>, vector<8x128xf32> -> vector<8x128xf32>
    %85 = arith.addf %83, %84 : vector<8x128xf32>
    %86 = arith.mulf %85, %16 : vector<8x128xf32>
    %87 = math.tanh %86 : vector<8x128xf32>
    %88 = arith.mulf %87, %16 : vector<8x128xf32>
    %89 = arith.addf %88, %18 : vector<8x128xf32>
    %90 = vector.extract_strided_slice %89 {offsets = [0, 0], sizes = [8, 32], strides = [1, 1]} : vector<8x128xf32> to vector<8x32xf32>
    %91 = vector.extract_strided_slice %89 {offsets = [0, 32], sizes = [8, 32], strides = [1, 1]} : vector<8x128xf32> to vector<8x32xf32>
    %92 = vector.extract_strided_slice %89 {offsets = [0, 64], sizes = [8, 32], strides = [1, 1]} : vector<8x128xf32> to vector<8x32xf32>
    %93 = vector.extract_strided_slice %89 {offsets = [0, 96], sizes = [8, 32], strides = [1, 1]} : vector<8x128xf32> to vector<8x32xf32>
    %94 = arith.mulf %91, %76 : vector<8x32xf32>
    %95 = arith.mulf %90, %92 : vector<8x32xf32>
    %96 = arith.addf %94, %95 : vector<8x32xf32>
    %97 = math.tanh %96 : vector<8x32xf32>
    %98 = arith.mulf %93, %97 : vector<8x32xf32>
    %c3_37 = arith.constant 3 : index
    %c0_38 = arith.constant 0 : index
    %c0_39 = arith.constant 0 : index
    %99 = vector.load %arg12[%c3_37, %c0_38, %c0_39] : memref<8x8x32xf32, #tpu.memory_space<vmem>>, vector<1x8x32xf32>
    %100 = vector.shape_cast %99 : vector<1x8x32xf32> to vector<8x32xf32>
    %101 = vector.shape_cast %98 : vector<8x32xf32> to vector<1x8x32xf32>
    tpu.vector_store %arg12[%c3_37, %c0_38, %c0_39], %101 {strides = array<i32>} : memref<8x8x32xf32, #tpu.memory_space<vmem>>, vector<1x8x32xf32>,
    %c4 = arith.constant 4 : index
    %c0_40 = arith.constant 0 : index
    %c0_41 = arith.constant 0 : index
    %102 = vector.load %arg11[%c4, %c0_40, %c0_41] : memref<8x8x128xf32, #tpu.memory_space<vmem>>, vector<1x8x128xf32>
    %103 = vector.shape_cast %102 : vector<1x8x128xf32> to vector<8x128xf32>
    %cst_42 = arith.constant dense<0.000000e+00> : vector<8x128xf32>
    %104 = tpu.matmul %98, %26, %cst_42 {dimension_numbers = #tpu.dot_dimension_numbers<[1], [0], [0], [1], [0, 0, 1, 1], [], []>} : vector<8x32xf32>, vector<32x128xf32>, vector<8x128xf32> -> vector<8x128xf32>
    %105 = arith.addf %103, %104 : vector<8x128xf32>
    %106 = arith.mulf %105, %16 : vector<8x128xf32>
    %107 = math.tanh %106 : vector<8x128xf32>
    %108 = arith.mulf %107, %16 : vector<8x128xf32>
    %109 = arith.addf %108, %18 : vector<8x128xf32>
    %110 = vector.extract_strided_slice %109 {offsets = [0, 0], sizes = [8, 32], strides = [1, 1]} : vector<8x128xf32> to vector<8x32xf32>
    %111 = vector.extract_strided_slice %109 {offsets = [0, 32], sizes = [8, 32], strides = [1, 1]} : vector<8x128xf32> to vector<8x32xf32>
    %112 = vector.extract_strided_slice %109 {offsets = [0, 64], sizes = [8, 32], strides = [1, 1]} : vector<8x128xf32> to vector<8x32xf32>
    %113 = vector.extract_strided_slice %109 {offsets = [0, 96], sizes = [8, 32], strides = [1, 1]} : vector<8x128xf32> to vector<8x32xf32>
    %114 = arith.mulf %111, %96 : vector<8x32xf32>
    %115 = arith.mulf %110, %112 : vector<8x32xf32>
    %116 = arith.addf %114, %115 : vector<8x32xf32>
    %117 = math.tanh %116 : vector<8x32xf32>
    %118 = arith.mulf %113, %117 : vector<8x32xf32>
    %c4_43 = arith.constant 4 : index
    %c0_44 = arith.constant 0 : index
    %c0_45 = arith.constant 0 : index
    %119 = vector.load %arg12[%c4_43, %c0_44, %c0_45] : memref<8x8x32xf32, #tpu.memory_space<vmem>>, vector<1x8x32xf32>
    %120 = vector.shape_cast %119 : vector<1x8x32xf32> to vector<8x32xf32>
    %121 = vector.shape_cast %118 : vector<8x32xf32> to vector<1x8x32xf32>
    tpu.vector_store %arg12[%c4_43, %c0_44, %c0_45], %121 {strides = array<i32>} : memref<8x8x32xf32, #tpu.memory_space<vmem>>, vector<1x8x32xf32>,
    %c5 = arith.constant 5 : index
    %c0_46 = arith.constant 0 : index
    %c0_47 = arith.constant 0 : index
    %122 = vector.load %arg11[%c5, %c0_46, %c0_47] : memref<8x8x128xf32, #tpu.memory_space<vmem>>, vector<1x8x128xf32>
    %123 = vector.shape_cast %122 : vector<1x8x128xf32> to vector<8x128xf32>
    %cst_48 = arith.constant dense<0.000000e+00> : vector<8x128xf32>
    %124 = tpu.matmul %118, %26, %cst_48 {dimension_numbers = #tpu.dot_dimension_numbers<[1], [0], [0], [1], [0, 0, 1, 1], [], []>} : vector<8x32xf32>, vector<32x128xf32>, vector<8x128xf32> -> vector<8x128xf32>
    %125 = arith.addf %123, %124 : vector<8x128xf32>
    %126 = arith.mulf %125, %16 : vector<8x128xf32>
    %127 = math.tanh %126 : vector<8x128xf32>
    %128 = arith.mulf %127, %16 : vector<8x128xf32>
    %129 = arith.addf %128, %18 : vector<8x128xf32>
    %130 = vector.extract_strided_slice %129 {offsets = [0, 0], sizes = [8, 32], strides = [1, 1]} : vector<8x128xf32> to vector<8x32xf32>
    %131 = vector.extract_strided_slice %129 {offsets = [0, 32], sizes = [8, 32], strides = [1, 1]} : vector<8x128xf32> to vector<8x32xf32>
    %132 = vector.extract_strided_slice %129 {offsets = [0, 64], sizes = [8, 32], strides = [1, 1]} : vector<8x128xf32> to vector<8x32xf32>
    %133 = vector.extract_strided_slice %129 {offsets = [0, 96], sizes = [8, 32], strides = [1, 1]} : vector<8x128xf32> to vector<8x32xf32>
    %134 = arith.mulf %131, %116 : vector<8x32xf32>
    %135 = arith.mulf %130, %132 : vector<8x32xf32>
    %136 = arith.addf %134, %135 : vector<8x32xf32>
    %137 = math.tanh %136 : vector<8x32xf32>
    %138 = arith.mulf %133, %137 : vector<8x32xf32>
    %c5_49 = arith.constant 5 : index
    %c0_50 = arith.constant 0 : index
    %c0_51 = arith.constant 0 : index
    %139 = vector.load %arg12[%c5_49, %c0_50, %c0_51] : memref<8x8x32xf32, #tpu.memory_space<vmem>>, vector<1x8x32xf32>
    %140 = vector.shape_cast %139 : vector<1x8x32xf32> to vector<8x32xf32>
    %141 = vector.shape_cast %138 : vector<8x32xf32> to vector<1x8x32xf32>
    tpu.vector_store %arg12[%c5_49, %c0_50, %c0_51], %141 {strides = array<i32>} : memref<8x8x32xf32, #tpu.memory_space<vmem>>, vector<1x8x32xf32>,
    %c6 = arith.constant 6 : index
    %c0_52 = arith.constant 0 : index
    %c0_53 = arith.constant 0 : index
    %142 = vector.load %arg11[%c6, %c0_52, %c0_53] : memref<8x8x128xf32, #tpu.memory_space<vmem>>, vector<1x8x128xf32>
    %143 = vector.shape_cast %142 : vector<1x8x128xf32> to vector<8x128xf32>
    %cst_54 = arith.constant dense<0.000000e+00> : vector<8x128xf32>
    %144 = tpu.matmul %138, %26, %cst_54 {dimension_numbers = #tpu.dot_dimension_numbers<[1], [0], [0], [1], [0, 0, 1, 1], [], []>} : vector<8x32xf32>, vector<32x128xf32>, vector<8x128xf32> -> vector<8x128xf32>
    %145 = arith.addf %143, %144 : vector<8x128xf32>
    %146 = arith.mulf %145, %16 : vector<8x128xf32>
    %147 = math.tanh %146 : vector<8x128xf32>
    %148 = arith.mulf %147, %16 : vector<8x128xf32>
    %149 = arith.addf %148, %18 : vector<8x128xf32>
    %150 = vector.extract_strided_slice %149 {offsets = [0, 0], sizes = [8, 32], strides = [1, 1]} : vector<8x128xf32> to vector<8x32xf32>
    %151 = vector.extract_strided_slice %149 {offsets = [0, 32], sizes = [8, 32], strides = [1, 1]} : vector<8x128xf32> to vector<8x32xf32>
    %152 = vector.extract_strided_slice %149 {offsets = [0, 64], sizes = [8, 32], strides = [1, 1]} : vector<8x128xf32> to vector<8x32xf32>
    %153 = vector.extract_strided_slice %149 {offsets = [0, 96], sizes = [8, 32], strides = [1, 1]} : vector<8x128xf32> to vector<8x32xf32>
    %154 = arith.mulf %151, %136 : vector<8x32xf32>
    %155 = arith.mulf %150, %152 : vector<8x32xf32>
    %156 = arith.addf %154, %155 : vector<8x32xf32>
    %157 = math.tanh %156 : vector<8x32xf32>
    %158 = arith.mulf %153, %157 : vector<8x32xf32>
    %c6_55 = arith.constant 6 : index
    %c0_56 = arith.constant 0 : index
    %c0_57 = arith.constant 0 : index
    %159 = vector.load %arg12[%c6_55, %c0_56, %c0_57] : memref<8x8x32xf32, #tpu.memory_space<vmem>>, vector<1x8x32xf32>
    %160 = vector.shape_cast %159 : vector<1x8x32xf32> to vector<8x32xf32>
    %161 = vector.shape_cast %158 : vector<8x32xf32> to vector<1x8x32xf32>
    tpu.vector_store %arg12[%c6_55, %c0_56, %c0_57], %161 {strides = array<i32>} : memref<8x8x32xf32, #tpu.memory_space<vmem>>, vector<1x8x32xf32>,
    %c7 = arith.constant 7 : index
    %c0_58 = arith.constant 0 : index
    %c0_59 = arith.constant 0 : index
    %162 = vector.load %arg11[%c7, %c0_58, %c0_59] : memref<8x8x128xf32, #tpu.memory_space<vmem>>, vector<1x8x128xf32>
    %163 = vector.shape_cast %162 : vector<1x8x128xf32> to vector<8x128xf32>
    %cst_60 = arith.constant dense<0.000000e+00> : vector<8x128xf32>
    %164 = tpu.matmul %158, %26, %cst_60 {dimension_numbers = #tpu.dot_dimension_numbers<[1], [0], [0], [1], [0, 0, 1, 1], [], []>} : vector<8x32xf32>, vector<32x128xf32>, vector<8x128xf32> -> vector<8x128xf32>
    %165 = arith.addf %163, %164 : vector<8x128xf32>
    %166 = arith.mulf %165, %16 : vector<8x128xf32>
    %167 = math.tanh %166 : vector<8x128xf32>
    %168 = arith.mulf %167, %16 : vector<8x128xf32>
    %169 = arith.addf %168, %18 : vector<8x128xf32>
    %170 = vector.extract_strided_slice %169 {offsets = [0, 0], sizes = [8, 32], strides = [1, 1]} : vector<8x128xf32> to vector<8x32xf32>
    %171 = vector.extract_strided_slice %169 {offsets = [0, 32], sizes = [8, 32], strides = [1, 1]} : vector<8x128xf32> to vector<8x32xf32>
    %172 = vector.extract_strided_slice %169 {offsets = [0, 64], sizes = [8, 32], strides = [1, 1]} : vector<8x128xf32> to vector<8x32xf32>
    %173 = vector.extract_strided_slice %169 {offsets = [0, 96], sizes = [8, 32], strides = [1, 1]} : vector<8x128xf32> to vector<8x32xf32>
    %174 = arith.mulf %171, %156 : vector<8x32xf32>
    %175 = arith.mulf %170, %172 : vector<8x32xf32>
    %176 = arith.addf %174, %175 : vector<8x32xf32>
    %177 = math.tanh %176 : vector<8x32xf32>
    %178 = arith.mulf %173, %177 : vector<8x32xf32>
    %c7_61 = arith.constant 7 : index
    %c0_62 = arith.constant 0 : index
    %c0_63 = arith.constant 0 : index
    %179 = vector.load %arg12[%c7_61, %c0_62, %c0_63] : memref<8x8x32xf32, #tpu.memory_space<vmem>>, vector<1x8x32xf32>
    %180 = vector.shape_cast %179 : vector<1x8x32xf32> to vector<8x32xf32>
    %181 = vector.shape_cast %178 : vector<8x32xf32> to vector<1x8x32xf32>
    tpu.vector_store %arg12[%c7_61, %c0_62, %c0_63], %181 {strides = array<i32>} : memref<8x8x32xf32, #tpu.memory_space<vmem>>, vector<1x8x32xf32>,
    %c0_64 = arith.constant 0 : index
    %c0_65 = arith.constant 0 : index
    %c0_66 = arith.constant 0 : index
    %182 = vector.load %arg12[%c0_64, %c0_65, %c0_66] : memref<8x8x32xf32, #tpu.memory_space<vmem>>, vector<8x8x32xf32>
    %183 = vector.shape_cast %182 : vector<8x8x32xf32> to vector<64x32xf32>
    %c0_67 = arith.constant 0 : index
    %c0_68 = arith.constant 0 : index
    %184 = vector.load %arg5[%c0_67, %c0_68] : memref<32x128xf32, #tpu.memory_space<vmem>>, vector<32x128xf32>
    %cst_69 = arith.constant dense<0.000000e+00> : vector<64x128xf32>
    %185 = tpu.matmul %183, %184, %cst_69 {dimension_numbers = #tpu.dot_dimension_numbers<[1], [0], [0], [1], [0, 0, 1, 1], [], []>} : vector<64x32xf32>, vector<32x128xf32>, vector<64x128xf32> -> vector<64x128xf32>
    %c0_70 = arith.constant 0 : index
    %c0_71 = arith.constant 0 : index
    %186 = vector.load %arg7[%c0_70, %c0_71] : memref<1x128xf32, #tpu.memory_space<vmem>>, vector<1x128xf32>
    %187 = vector.broadcast %186 : vector<1x128xf32> to vector<64x128xf32>
    %188 = arith.addf %185, %187 : vector<64x128xf32>
    %189 = vector.shape_cast %188 : vector<64x128xf32> to vector<8x8x128xf32>
    %c0_72 = arith.constant 0 : index
    %c0_73 = arith.constant 0 : index
    %c0_74 = arith.constant 0 : index
    %190 = vector.load %arg11[%c0_72, %c0_73, %c0_74] : memref<8x8x128xf32, #tpu.memory_space<vmem>>, vector<8x8x128xf32>
    tpu.vector_store %arg11[%c0_72, %c0_73, %c0_74], %189 {strides = array<i32>} : memref<8x8x128xf32, #tpu.memory_space<vmem>>, vector<8x8x128xf32>,
    %c0_75 = arith.constant 0 : index
    %c0_76 = arith.constant 0 : index
    %191 = vector.load %arg6[%c0_75, %c0_76] : memref<32x128xf32, #tpu.memory_space<vmem>>, vector<32x128xf32>
    %c0_77 = arith.constant 0 : index
    %c0_78 = arith.constant 0 : index
    %c0_79 = arith.constant 0 : index
    %192 = vector.load %arg11[%c0_77, %c0_78, %c0_79] : memref<8x8x128xf32, #tpu.memory_space<vmem>>, vector<1x8x128xf32>
    %193 = vector.shape_cast %192 : vector<1x8x128xf32> to vector<8x128xf32>
    %194 = arith.mulf %193, %16 : vector<8x128xf32>
    %195 = math.tanh %194 : vector<8x128xf32>
    %196 = arith.mulf %195, %16 : vector<8x128xf32>
    %197 = arith.addf %196, %18 : vector<8x128xf32>
    %198 = vector.extract_strided_slice %197 {offsets = [0, 0], sizes = [8, 32], strides = [1, 1]} : vector<8x128xf32> to vector<8x32xf32>
    %199 = vector.extract_strided_slice %197 {offsets = [0, 64], sizes = [8, 32], strides = [1, 1]} : vector<8x128xf32> to vector<8x32xf32>
    %200 = vector.extract_strided_slice %197 {offsets = [0, 96], sizes = [8, 32], strides = [1, 1]} : vector<8x128xf32> to vector<8x32xf32>
    %201 = arith.mulf %198, %199 : vector<8x32xf32>
    %202 = math.tanh %201 : vector<8x32xf32>
    %203 = arith.mulf %200, %202 : vector<8x32xf32>
    %c1_80 = arith.constant 1 : index
    %c0_81 = arith.constant 0 : index
    %c0_82 = arith.constant 0 : index
    %204 = vector.load %arg11[%c1_80, %c0_81, %c0_82] : memref<8x8x128xf32, #tpu.memory_space<vmem>>, vector<1x8x128xf32>
    %205 = vector.shape_cast %204 : vector<1x8x128xf32> to vector<8x128xf32>
    %cst_83 = arith.constant dense<0.000000e+00> : vector<8x128xf32>
    %206 = tpu.matmul %203, %191, %cst_83 {dimension_numbers = #tpu.dot_dimension_numbers<[1], [0], [0], [1], [0, 0, 1, 1], [], []>} : vector<8x32xf32>, vector<32x128xf32>, vector<8x128xf32> -> vector<8x128xf32>
    %207 = arith.addf %205, %206 : vector<8x128xf32>
    %208 = arith.mulf %207, %16 : vector<8x128xf32>
    %209 = math.tanh %208 : vector<8x128xf32>
    %210 = arith.mulf %209, %16 : vector<8x128xf32>
    %211 = arith.addf %210, %18 : vector<8x128xf32>
    %212 = vector.extract_strided_slice %211 {offsets = [0, 0], sizes = [8, 32], strides = [1, 1]} : vector<8x128xf32> to vector<8x32xf32>
    %213 = vector.extract_strided_slice %211 {offsets = [0, 32], sizes = [8, 32], strides = [1, 1]} : vector<8x128xf32> to vector<8x32xf32>
    %214 = vector.extract_strided_slice %211 {offsets = [0, 64], sizes = [8, 32], strides = [1, 1]} : vector<8x128xf32> to vector<8x32xf32>
    %215 = vector.extract_strided_slice %211 {offsets = [0, 96], sizes = [8, 32], strides = [1, 1]} : vector<8x128xf32> to vector<8x32xf32>
    %216 = arith.mulf %213, %201 : vector<8x32xf32>
    %217 = arith.mulf %212, %214 : vector<8x32xf32>
    %218 = arith.addf %216, %217 : vector<8x32xf32>
    %219 = math.tanh %218 : vector<8x32xf32>
    %220 = arith.mulf %215, %219 : vector<8x32xf32>
    %c2_84 = arith.constant 2 : index
    %c0_85 = arith.constant 0 : index
    %c0_86 = arith.constant 0 : index
    %221 = vector.load %arg11[%c2_84, %c0_85, %c0_86] : memref<8x8x128xf32, #tpu.memory_space<vmem>>, vector<1x8x128xf32>
    %222 = vector.shape_cast %221 : vector<1x8x128xf32> to vector<8x128xf32>
    %cst_87 = arith.constant dense<0.000000e+00> : vector<8x128xf32>
    %223 = tpu.matmul %220, %191, %cst_87 {dimension_numbers = #tpu.dot_dimension_numbers<[1], [0], [0], [1], [0, 0, 1, 1], [], []>} : vector<8x32xf32>, vector<32x128xf32>, vector<8x128xf32> -> vector<8x128xf32>
    %224 = arith.addf %222, %223 : vector<8x128xf32>
    %225 = arith.mulf %224, %16 : vector<8x128xf32>
    %226 = math.tanh %225 : vector<8x128xf32>
    %227 = arith.mulf %226, %16 : vector<8x128xf32>
    %228 = arith.addf %227, %18 : vector<8x128xf32>
    %229 = vector.extract_strided_slice %228 {offsets = [0, 0], sizes = [8, 32], strides = [1, 1]} : vector<8x128xf32> to vector<8x32xf32>
    %230 = vector.extract_strided_slice %228 {offsets = [0, 32], sizes = [8, 32], strides = [1, 1]} : vector<8x128xf32> to vector<8x32xf32>
    %231 = vector.extract_strided_slice %228 {offsets = [0, 64], sizes = [8, 32], strides = [1, 1]} : vector<8x128xf32> to vector<8x32xf32>
    %232 = vector.extract_strided_slice %228 {offsets = [0, 96], sizes = [8, 32], strides = [1, 1]} : vector<8x128xf32> to vector<8x32xf32>
    %233 = arith.mulf %230, %218 : vector<8x32xf32>
    %234 = arith.mulf %229, %231 : vector<8x32xf32>
    %235 = arith.addf %233, %234 : vector<8x32xf32>
    %236 = math.tanh %235 : vector<8x32xf32>
    %237 = arith.mulf %232, %236 : vector<8x32xf32>
    %c3_88 = arith.constant 3 : index
    %c0_89 = arith.constant 0 : index
    %c0_90 = arith.constant 0 : index
    %238 = vector.load %arg11[%c3_88, %c0_89, %c0_90] : memref<8x8x128xf32, #tpu.memory_space<vmem>>, vector<1x8x128xf32>
    %239 = vector.shape_cast %238 : vector<1x8x128xf32> to vector<8x128xf32>
    %cst_91 = arith.constant dense<0.000000e+00> : vector<8x128xf32>
    %240 = tpu.matmul %237, %191, %cst_91 {dimension_numbers = #tpu.dot_dimension_numbers<[1], [0], [0], [1], [0, 0, 1, 1], [], []>} : vector<8x32xf32>, vector<32x128xf32>, vector<8x128xf32> -> vector<8x128xf32>
    %241 = arith.addf %239, %240 : vector<8x128xf32>
    %242 = arith.mulf %241, %16 : vector<8x128xf32>
    %243 = math.tanh %242 : vector<8x128xf32>
    %244 = arith.mulf %243, %16 : vector<8x128xf32>
    %245 = arith.addf %244, %18 : vector<8x128xf32>
    %246 = vector.extract_strided_slice %245 {offsets = [0, 0], sizes = [8, 32], strides = [1, 1]} : vector<8x128xf32> to vector<8x32xf32>
    %247 = vector.extract_strided_slice %245 {offsets = [0, 32], sizes = [8, 32], strides = [1, 1]} : vector<8x128xf32> to vector<8x32xf32>
    %248 = vector.extract_strided_slice %245 {offsets = [0, 64], sizes = [8, 32], strides = [1, 1]} : vector<8x128xf32> to vector<8x32xf32>
    %249 = vector.extract_strided_slice %245 {offsets = [0, 96], sizes = [8, 32], strides = [1, 1]} : vector<8x128xf32> to vector<8x32xf32>
    %250 = arith.mulf %247, %235 : vector<8x32xf32>
    %251 = arith.mulf %246, %248 : vector<8x32xf32>
    %252 = arith.addf %250, %251 : vector<8x32xf32>
    %253 = math.tanh %252 : vector<8x32xf32>
    %254 = arith.mulf %249, %253 : vector<8x32xf32>
    %c4_92 = arith.constant 4 : index
    %c0_93 = arith.constant 0 : index
    %c0_94 = arith.constant 0 : index
    %255 = vector.load %arg11[%c4_92, %c0_93, %c0_94] : memref<8x8x128xf32, #tpu.memory_space<vmem>>, vector<1x8x128xf32>
    %256 = vector.shape_cast %255 : vector<1x8x128xf32> to vector<8x128xf32>
    %cst_95 = arith.constant dense<0.000000e+00> : vector<8x128xf32>
    %257 = tpu.matmul %254, %191, %cst_95 {dimension_numbers = #tpu.dot_dimension_numbers<[1], [0], [0], [1], [0, 0, 1, 1], [], []>} : vector<8x32xf32>, vector<32x128xf32>, vector<8x128xf32> -> vector<8x128xf32>
    %258 = arith.addf %256, %257 : vector<8x128xf32>
    %259 = arith.mulf %258, %16 : vector<8x128xf32>
    %260 = math.tanh %259 : vector<8x128xf32>
    %261 = arith.mulf %260, %16 : vector<8x128xf32>
    %262 = arith.addf %261, %18 : vector<8x128xf32>
    %263 = vector.extract_strided_slice %262 {offsets = [0, 0], sizes = [8, 32], strides = [1, 1]} : vector<8x128xf32> to vector<8x32xf32>
    %264 = vector.extract_strided_slice %262 {offsets = [0, 32], sizes = [8, 32], strides = [1, 1]} : vector<8x128xf32> to vector<8x32xf32>
    %265 = vector.extract_strided_slice %262 {offsets = [0, 64], sizes = [8, 32], strides = [1, 1]} : vector<8x128xf32> to vector<8x32xf32>
    %266 = vector.extract_strided_slice %262 {offsets = [0, 96], sizes = [8, 32], strides = [1, 1]} : vector<8x128xf32> to vector<8x32xf32>
    %267 = arith.mulf %264, %252 : vector<8x32xf32>
    %268 = arith.mulf %263, %265 : vector<8x32xf32>
    %269 = arith.addf %267, %268 : vector<8x32xf32>
    %270 = math.tanh %269 : vector<8x32xf32>
    %271 = arith.mulf %266, %270 : vector<8x32xf32>
    %c5_96 = arith.constant 5 : index
    %c0_97 = arith.constant 0 : index
    %c0_98 = arith.constant 0 : index
    %272 = vector.load %arg11[%c5_96, %c0_97, %c0_98] : memref<8x8x128xf32, #tpu.memory_space<vmem>>, vector<1x8x128xf32>
    %273 = vector.shape_cast %272 : vector<1x8x128xf32> to vector<8x128xf32>
    %cst_99 = arith.constant dense<0.000000e+00> : vector<8x128xf32>
    %274 = tpu.matmul %271, %191, %cst_99 {dimension_numbers = #tpu.dot_dimension_numbers<[1], [0], [0], [1], [0, 0, 1, 1], [], []>} : vector<8x32xf32>, vector<32x128xf32>, vector<8x128xf32> -> vector<8x128xf32>
    %275 = arith.addf %273, %274 : vector<8x128xf32>
    %276 = arith.mulf %275, %16 : vector<8x128xf32>
    %277 = math.tanh %276 : vector<8x128xf32>
    %278 = arith.mulf %277, %16 : vector<8x128xf32>
    %279 = arith.addf %278, %18 : vector<8x128xf32>
    %280 = vector.extract_strided_slice %279 {offsets = [0, 0], sizes = [8, 32], strides = [1, 1]} : vector<8x128xf32> to vector<8x32xf32>
    %281 = vector.extract_strided_slice %279 {offsets = [0, 32], sizes = [8, 32], strides = [1, 1]} : vector<8x128xf32> to vector<8x32xf32>
    %282 = vector.extract_strided_slice %279 {offsets = [0, 64], sizes = [8, 32], strides = [1, 1]} : vector<8x128xf32> to vector<8x32xf32>
    %283 = vector.extract_strided_slice %279 {offsets = [0, 96], sizes = [8, 32], strides = [1, 1]} : vector<8x128xf32> to vector<8x32xf32>
    %284 = arith.mulf %281, %269 : vector<8x32xf32>
    %285 = arith.mulf %280, %282 : vector<8x32xf32>
    %286 = arith.addf %284, %285 : vector<8x32xf32>
    %287 = math.tanh %286 : vector<8x32xf32>
    %288 = arith.mulf %283, %287 : vector<8x32xf32>
    %c6_100 = arith.constant 6 : index
    %c0_101 = arith.constant 0 : index
    %c0_102 = arith.constant 0 : index
    %289 = vector.load %arg11[%c6_100, %c0_101, %c0_102] : memref<8x8x128xf32, #tpu.memory_space<vmem>>, vector<1x8x128xf32>
    %290 = vector.shape_cast %289 : vector<1x8x128xf32> to vector<8x128xf32>
    %cst_103 = arith.constant dense<0.000000e+00> : vector<8x128xf32>
    %291 = tpu.matmul %288, %191, %cst_103 {dimension_numbers = #tpu.dot_dimension_numbers<[1], [0], [0], [1], [0, 0, 1, 1], [], []>} : vector<8x32xf32>, vector<32x128xf32>, vector<8x128xf32> -> vector<8x128xf32>
    %292 = arith.addf %290, %291 : vector<8x128xf32>
    %293 = arith.mulf %292, %16 : vector<8x128xf32>
    %294 = math.tanh %293 : vector<8x128xf32>
    %295 = arith.mulf %294, %16 : vector<8x128xf32>
    %296 = arith.addf %295, %18 : vector<8x128xf32>
    %297 = vector.extract_strided_slice %296 {offsets = [0, 0], sizes = [8, 32], strides = [1, 1]} : vector<8x128xf32> to vector<8x32xf32>
    %298 = vector.extract_strided_slice %296 {offsets = [0, 32], sizes = [8, 32], strides = [1, 1]} : vector<8x128xf32> to vector<8x32xf32>
    %299 = vector.extract_strided_slice %296 {offsets = [0, 64], sizes = [8, 32], strides = [1, 1]} : vector<8x128xf32> to vector<8x32xf32>
    %300 = vector.extract_strided_slice %296 {offsets = [0, 96], sizes = [8, 32], strides = [1, 1]} : vector<8x128xf32> to vector<8x32xf32>
    %301 = arith.mulf %298, %286 : vector<8x32xf32>
    %302 = arith.mulf %297, %299 : vector<8x32xf32>
    %303 = arith.addf %301, %302 : vector<8x32xf32>
    %304 = math.tanh %303 : vector<8x32xf32>
    %305 = arith.mulf %300, %304 : vector<8x32xf32>
    %c7_104 = arith.constant 7 : index
    %c0_105 = arith.constant 0 : index
    %c0_106 = arith.constant 0 : index
    %306 = vector.load %arg11[%c7_104, %c0_105, %c0_106] : memref<8x8x128xf32, #tpu.memory_space<vmem>>, vector<1x8x128xf32>
    %307 = vector.shape_cast %306 : vector<1x8x128xf32> to vector<8x128xf32>
    %cst_107 = arith.constant dense<0.000000e+00> : vector<8x128xf32>
    %308 = tpu.matmul %305, %191, %cst_107 {dimension_numbers = #tpu.dot_dimension_numbers<[1], [0], [0], [1], [0, 0, 1, 1], [], []>} : vector<8x32xf32>, vector<32x128xf32>, vector<8x128xf32> -> vector<8x128xf32>
    %309 = arith.addf %307, %308 : vector<8x128xf32>
    %310 = arith.mulf %309, %16 : vector<8x128xf32>
    %311 = math.tanh %310 : vector<8x128xf32>
    %312 = arith.mulf %311, %16 : vector<8x128xf32>
    %313 = arith.addf %312, %18 : vector<8x128xf32>
    %314 = vector.extract_strided_slice %313 {offsets = [0, 0], sizes = [8, 32], strides = [1, 1]} : vector<8x128xf32> to vector<8x32xf32>
    %315 = vector.extract_strided_slice %313 {offsets = [0, 32], sizes = [8, 32], strides = [1, 1]} : vector<8x128xf32> to vector<8x32xf32>
    %316 = vector.extract_strided_slice %313 {offsets = [0, 64], sizes = [8, 32], strides = [1, 1]} : vector<8x128xf32> to vector<8x32xf32>
    %317 = vector.extract_strided_slice %313 {offsets = [0, 96], sizes = [8, 32], strides = [1, 1]} : vector<8x128xf32> to vector<8x32xf32>
    %318 = arith.mulf %315, %303 : vector<8x32xf32>
    %319 = arith.mulf %314, %316 : vector<8x32xf32>
    %320 = arith.addf %318, %319 : vector<8x32xf32>
    %321 = math.tanh %320 : vector<8x32xf32>
    %322 = arith.mulf %317, %321 : vector<8x32xf32>
    %c0_108 = arith.constant 0 : index
    %c0_109 = arith.constant 0 : index
    %323 = vector.load %arg8[%c0_108, %c0_109] : memref<32x8xf32, #tpu.memory_space<vmem>>, vector<32x8xf32>
    %cst_110 = arith.constant dense<0.000000e+00> : vector<8x8xf32>
    %324 = tpu.matmul %322, %323, %cst_110 {dimension_numbers = #tpu.dot_dimension_numbers<[1], [0], [0], [1], [0, 0, 1, 1], [], []>} : vector<8x32xf32>, vector<32x8xf32>, vector<8x8xf32> -> vector<8x8xf32>
    %c0_111 = arith.constant 0 : index
    %c0_112 = arith.constant 0 : index
    %325 = vector.load %arg9[%c0_111, %c0_112] : memref<1x8xf32, #tpu.memory_space<vmem>>, vector<1x8xf32>
    %326 = vector.broadcast %325 : vector<1x8xf32> to vector<8x8xf32>
    %327 = arith.addf %324, %326 : vector<8x8xf32>
    %328 = arith.negf %327 : vector<8x8xf32>
    %329 = math.exp %328 : vector<8x8xf32>
    %cst_113 = arith.constant 1.000000e+00 : f32
    %330 = vector.broadcast %cst_113 : f32 to vector<8x8xf32>
    %331 = arith.addf %330, %329 : vector<8x8xf32>
    %332 = arith.divf %330, %331 : vector<8x8xf32>
    %c0_114 = arith.constant 0 : index
    %c0_115 = arith.constant 0 : index
    %333 = vector.load %arg10[%c0_114, %c0_115] : memref<8x8xf32, #tpu.memory_space<vmem>>, vector<8x8xf32>
    tpu.vector_store %arg10[%c0_114, %c0_115], %332 {strides = array<i32>} : memref<8x8xf32, #tpu.memory_space<vmem>>, vector<8x8xf32>,
    return
  }
}

</mosaic_0001>

<bundles_post_ra>
// kernel: model_forward.1
= control target key start
LH: loop header
LB: loop body
LE: loop exit
PB: predicated region body
PF: predicated region fallthrough
CT: control target
= control target key end

     0   :  { %vm125_vm0 = vcmask 1041408   ;;  %v1286_v0 = vmov 0   ;;  %v43_v14 = vlaneseq  ;;  %vm100_vm1 = vcmask 408576   ;;  %s1291_s22 = smov 32   ;;  %s1747_s0 = inlined_call_operand.vmem [shape: s32[64,1], index: 0, kind: input, shape index: {}]   ;;  %s1748_s1 = inlined_call_operand.vmem [shape: f32[50,32], index: 1, kind: input, shape index: {}]   ;;  %s1749_s2 = inlined_call_operand.vmem [shape: f32[32,128], index: 2, kind: input, shape index: {}]   ;;  %s1750_s4 = inlined_call_operand.vmem [shape: f32[1,128], index: 4, kind: input, shape index: {}]   ;;  %s1751_s3 = inlined_call_operand.vmem [shape: f32[32,128], index: 3, kind: input, shape index: {}]   ;;  %s1752_s5 = inlined_call_operand.vmem [shape: f32[32,128], index: 5, kind: input, shape index: {}]   ;;  %s1753_s7 = inlined_call_operand.vmem [shape: f32[1,128], index: 7, kind: input, shape index: {}]   ;;  %s1754_s6 = inlined_call_operand.vmem [shape: f32[32,128], index: 6, kind: input, shape index: {}]   ;;  %s1755_s9 = inlined_call_operand.vmem [shape: f32[1,8], index: 9, kind: input, shape index: {}]   ;;  %s1756_s8 = inlined_call_operand.vmem [shape: f32[32,8], index: 8, kind: input, shape index: {}]   ;;  %s1757_s10 = inlined_call_operand.vmem [shape: f32[8,8], index: 10, kind: output, shape index: {}]  }
   0x1   :  { %1212 = vset.pattern.permute.xlu0 %v1286_v0  ;;  %v35_v1 = vld [vmem:[%s1747_s0] sm:$0xff]  ;;  %1213 = vset.pattern.permute.xlu2 %v1286_v0  ;;  %v99_v2 = vld [vmem:[%s1748_s1 + $0x30] sm:$0x3]  ;;  %v98_v3 = vld [vmem:[%s1748_s1 + $0x28] sm:$0xff]  ;;  %v1287_v17 = vmov 0.0   ;;  %vm183_vm5 = vcmask 261120  }
   0x2   :  { %46 = vperm.xlu0 %1212, %v35_v1   ;;  %1214 = vset.pattern.permute.xlu1 %v1286_v0  ;;  %v97_v4 = vld [vmem:[%s1748_s1 + $0x20] sm:$0xff]  ;;  %v96_v5 = vld [vmem:[%s1748_s1 + $0x18] sm:$0xff]  ;;  %v36_v6 = vld [vmem:[%s1747_s0 + $0x8] sm:$0xff]  ;;  %v1386_v15 = vand.u32 127, %v43_v14  ;;  %v1288_v28 = vmov 0.5  }
   0x3   :  { %1165 = vmatpush.msk.msra.mxu0 %vm125_vm0, %v99_v2  ;;  %v95_v7 = vld [vmem:[%s1748_s1 + $0x10] sm:$0xff]  ;;  %v94_v8 = vld [vmem:[%s1748_s1 + $0x8] sm:$0xff]  ;;  %v93_v10 = vld [vmem:[%s1748_s1] sm:$0xff] }
   0x4   :  { %v37_v9 = vld [vmem:[%s1747_s0 + $0x10] sm:$0xff]  ;;  %v178_v11 = vld [vmem:[%s1749_s2 + $0x18] sm:$0xff]  ;;  %v176_v13 = vld [vmem:[%s1749_s2 + $0x8] sm:$0xff]  ;;  %vm170_vm6 = vcmp.ge.s32.totalorder %v1386_v15, 64  ;;  %vm171_vm7 = vcmp.lt.s32.totalorder %v1386_v15, 96 }
   0x5   :  { %139 = vmatpush.msra.mxu0 %v98_v3  ;;  %v177_v12 = vld [vmem:[%s1749_s2 + $0x10] sm:$0xff]  ;;  %220 = vmatpush.msra.mxu1 %v178_v11  ;;  %v175_v23 = vld [vmem:[%s1749_s2] sm:$0xff]  ;;  %vm172_vm8 = vmand %vm170_vm6, %vm171_vm7  ;;  %s1289_s2 = smov 64  }
   0x6   :  { %v1408_v27 = vld [vmem:[%s1750_s4] ss:$0 sm:$0xff]  ;;  %v1410_v29 = vsel %vm172_vm8, 1.0, %v1288_v28  ;;  %s1290_s4 = smov 96   ;;  %v1425_v40 = vld [vmem:[%s1751_s3 + $0x18] sm:$0xff]  ;;  %v1430_v41 = vld [vmem:[%s1751_s3 + $0x10] sm:$0xff] }
   0x7   :  { %140 = vmatpush.msra.mxu0 %v97_v4  ;;  %221 = vmatpush.msra.mxu1 %v177_v12  ;;  %v1415_v33 = vsub.f32 1.0, %v1410_v29  ;;  %v1437_v42 = vld [vmem:[%s1751_s3 + $0x8] sm:$0xff]  ;;  %v1444_v43 = vld [vmem:[%s1751_s3] sm:$0xff]  ;;  %v38_v62 = vld [vmem:[%s1747_s0 + $0x18] sm:$0xff] }
   0x8   :  { %298 = vmatpush.msra.mxu2 %v1425_v40  ;;  %458 = vmatpush.msra.mxu3 %v1425_v40 }
   0x9   :  { %141 = vmatpush.msra.mxu0 %v96_v5  ;;  %222 = vmatpush.msra.mxu1 %v176_v13 }
   0xa   :  { %49 = vperm.xlu0 %1212, %v36_v6   ;;  %299 = vmatpush.msra.mxu2 %v1430_v41 }
   0xb   :  { %142 = vmatpush.msra.mxu0 %v95_v7  ;;  %223 = vmatpush.msra.mxu1 %v175_v23 }
   0xc   :  { %459 = vmatpush.msra.mxu3 %v1430_v41  ;;  %300 = vmatpush.msra.mxu2 %v1437_v42 }
   0xd   :  { %143 = vmatpush.msra.mxu0 %v94_v8 }
   0xe   :  { %460 = vmatpush.msra.mxu3 %v1437_v42  ;;  %301 = vmatpush.msra.mxu2 %v1444_v43 }
   0xf   :  { %144 = vmatpush.msra.mxu0 %v93_v10 }
  0x10   :  { %461 = vmatpush.msra.mxu3 %v1444_v43  ;;  %354 = vmatpush.msrb.mxu2 %v1425_v40 }
  0x12   :  { %52 = vperm.xlu0 %1212, %v37_v9   ;;  %562 = vmatpush.msrb.mxu3 %v1425_v40 }
  0x13   :  { %355 = vmatpush.msrb.mxu2 %v1430_v41 }
  0x14   :  { %563 = vmatpush.msrb.mxu3 %v1430_v41 }
  0x15   :  { %356 = vmatpush.msrb.mxu2 %v1437_v42 }
  0x16   :  { %564 = vmatpush.msrb.mxu3 %v1437_v42 }
  0x17   :  { %357 = vmatpush.msrb.mxu2 %v1444_v43 }
  0x18   :  { %565 = vmatpush.msrb.mxu3 %v1444_v43 }
  0x74   :  { %v47_v16 = vpop.permute.xlu0 %46 }
  0x75   :  { %vm69_vm2 = vcmp.eq.s32.totalorder %v1386_v15, %v47_v16 }
  0x76   :  { %v1157_v18 = vsel %vm69_vm2, 1.0, %v1287_v17 }
  0x77   :  { %1166 = vmatmul.msk.f32.vlgmr.msra.gmra.mxu0 %vm100_vm1, %v1157_v18 }
  0x7c   :  { %v50_v19 = vpop.permute.xlu0 %49 }
  0x7d   :  { %vm70_vm3 = vcmp.eq.s32.totalorder %v1386_v15, %v50_v19 }
  0x7e   :  { %v1158_v20 = vsel %vm70_vm3, 1.0, %v1287_v17 }
  0x7f   :  { %1167 = vmatmul.msk.f32.gmra.mxu0 %vm100_vm1, %v1158_v20 }
  0x84   :  { %v53_v21 = vpop.permute.xlu0 %52 }
  0x85   :  { %vm71_vm4 = vcmp.eq.s32.totalorder %v1386_v15, %v53_v21 }
  0x86   :  { %v1159_v22 = vsel %vm71_vm4, 1.0, %v1287_v17 }
  0x87   :  { %1168 = vmatmul.msk.f32.gmra.mxu0 %vm100_vm1, %v1159_v22 }
  0xf4   :  { %v146_v24 = vpop.f32.mrf.mxu0 }
  0xf5   :  { %1174 = vmatmul.msk.f32.vlgmr.msra.gmra.mxu1 %vm183_vm5, %v146_v24 }
  0xfc   :  { %v149_v25 = vpop.f32.mrf.mxu0 }
  0xfd   :  { %1175 = vmatmul.msk.f32.gmra.mxu1 %vm183_vm5, %v149_v25 }
 0x104   :  { %v152_v26 = vpop.f32.mrf.mxu0 }
 0x105   :  { %1176 = vmatmul.msk.f32.gmra.mxu1 %vm183_vm5, %v152_v26 }
 0x172   :  { %v225_v30 = vpop.f32.mrf.mxu1 }
 0x173   :  { %v226_v31 = vadd.f32 %v1408_v27, %v225_v30 }
 0x175   :  { %v262_v32 = vmul.f32 %v226_v31, %v1410_v29 }
 0x177   :  { %1218 = vtanh.f32 %v262_v32 }
 0x17a   :  { %v228_v47 = vpop.f32.mrf.mxu1 }
 0x17b   :  { %v229_v48 = vadd.f32 %v1408_v27, %v228_v47 }
 0x17d   :  { %v1219_v34 = vpop.eup %1218 }
 0x17e   :  { %v264_v35 = vmul.f32 %v1219_v34, %v1410_v29 }
 0x180   :  { %v265_v36 = vadd.f32 %v264_v35, %v1415_v33 }
 0x182   :  { %267 = vrot.lane.b32.xlu1 %v265_v36, %s1289_s2  ;;  %v231_v5 = vpop.f32.mrf.mxu1 }
 0x183   :  { %v232_v6 = vadd.f32 %v1408_v27, %v231_v5 }
 0x1f4   :  { %v268_v37 = vpop.permute.xlu1 %267 }
 0x1f5   :  { %v270_v38 = vmul.f32 %v268_v37, %v265_v36  ;;  %v39_v37 = vld [vmem:[%s1747_s0 + $0x20] sm:$0xff] }
 0x1f7   :  { %1220 = vtanh.f32 %v270_v38 }
 0x1fd   :  { %v1221_v39 = vpop.eup %1220 }
 0x1fe   :  { %273 = vrot.lane.b32.xlu1 %v1221_v39, %s1290_s4 }
 0x206   :  { %312 = vrot.lane.b32.xlu1 %v270_v38, %s1291_s22 }
 0x270   :  { %v274_v44 = vpop.permute.xlu1 %273 }
 0x271   :  { %v276_v45 = vmul.f32 %v274_v44, %v265_v36 }
 0x273   :  { %278 = vrot.lane.b32.xlu2 %v276_v45, %s1291_s22 }
 0x278   :  { %v313_v57 = vpop.permute.xlu1 %312 }
 0x2cd   :  { %v279_v46 = vpop.permute.xlu2 %278 }
 0x2ce   :  { %281 = vst.msk [vmem:[#allocation3] sm:$0xff] %vm183_vm5, %v279_v46  ;;  %1182 = vmatmul.msk.f32.vlgmr.msra.gmra.mxu2 %vm183_vm5, %v279_v46 }
 0x2cf   :  { %406 = vmatpush.msra.mxu2 %v1425_v40 }
 0x2d1   :  { %407 = vmatpush.msra.mxu2 %v1430_v41 }
 0x2d3   :  { %408 = vmatpush.msra.mxu2 %v1437_v42 }
 0x2d5   :  { %409 = vmatpush.msra.mxu2 %v1444_v43 }
 0x351   :  { %v303_v49 = vpop.f32.mrf.mxu2 }
 0x352   :  { %v306_v50 = vadd.f32 %v303_v49, %v229_v48 }
 0x354   :  { %v307_v51 = vmul.f32 %v306_v50, %v1410_v29 }
 0x356   :  { %1222 = vtanh.f32 %v307_v51 }
 0x35c   :  { %v1223_v52 = vpop.eup %1222 }
 0x35d   :  { %v309_v53 = vmul.f32 %v1223_v52, %v1410_v29 }
 0x35f   :  { %v310_v54 = vadd.f32 %v309_v53, %v1415_v33 }
 0x361   :  { %317 = vrot.lane.b32.xlu2 %v310_v54, %s1289_s2  ;;  %v315_v58 = vmul.f32 %v313_v57, %v310_v54 }
 0x3bb   :  { %v318_v55 = vpop.permute.xlu2 %317 }
 0x3bc   :  { %v320_v56 = vmul.f32 %v318_v55, %v310_v54 }
 0x3be   :  { %322 = vrot.lane.b32.xlu2 %v320_v56, %s1291_s22 }
 0x418   :  { %v323_v59 = vpop.permute.xlu2 %322 }
 0x419   :  { %v325_v60 = vadd.f32 %v323_v59, %v315_v58  ;;  %v40_v58 = vld [vmem:[%s1747_s0 + $0x28] sm:$0xff] }
 0x41b   :  { %1224 = vtanh.f32 %v325_v60 }
 0x421   :  { %v1225_v61 = vpop.eup %1224 }
 0x422   :  { %328 = vrot.lane.b32.xlu0 %v1225_v61, %s1289_s2 }
 0x42a   :  { %55 = vperm.xlu0 %1212, %v38_v62  }
 0x494   :  { %v329_v63 = vpop.permute.xlu0 %328 }
 0x495   :  { %v331_v0 = vmul.f32 %v329_v63, %v310_v54  ;;  %v41_v63 = vld [vmem:[%s1747_s0 + $0x30] sm:$0xff] }
 0x497   :  { %333 = vrot.lane.b32.xlu1 %v331_v0, %s1291_s22 }
 0x49c   :  { %v56_v1 = vpop.permute.xlu0 %55 }
 0x49d   :  { %vm72_vm9 = vcmp.eq.s32.totalorder %v1386_v15, %v56_v1 }
 0x49e   :  { %v1160_v2 = vsel %vm72_vm9, 1.0, %v1287_v17 }
 0x49f   :  { %1169 = vmatmul.msk.f32.gmra.mxu0 %vm100_vm1, %v1160_v2 }
 0x509   :  { %v334_v3 = vpop.permute.xlu1 %333 }
 0x50a   :  { %337 = vst.msk [vmem:[#allocation3 + $0x8] sm:$0xff] %vm183_vm5, %v334_v3  ;;  %1183 = vmatmul.msk.f32.vlgmr.msrb.gmra.mxu2 %vm183_vm5, %v334_v3 }
 0x50b   :  { %510 = vmatpush.msrb.mxu2 %v1425_v40 }
 0x50d   :  { %511 = vmatpush.msrb.mxu2 %v1430_v41 }
 0x50f   :  { %512 = vmatpush.msrb.mxu2 %v1437_v42 }
 0x511   :  { %513 = vmatpush.msrb.mxu2 %v1444_v43 }
 0x51c   :  { %v155_v4 = vpop.f32.mrf.mxu0 }
 0x51d   :  { %1177 = vmatmul.msk.f32.gmra.mxu1 %vm183_vm5, %v155_v4 }
 0x58d   :  { %v359_v7 = vpop.f32.mrf.mxu2 }
 0x58e   :  { %v362_v8 = vadd.f32 %v359_v7, %v232_v6 }
 0x590   :  { %v363_v9 = vmul.f32 %v362_v8, %v1410_v29 }
 0x592   :  { %1226 = vtanh.f32 %v363_v9 }
 0x598   :  { %v1227_v10 = vpop.eup %1226 }
 0x599   :  { %v365_v11 = vmul.f32 %v1227_v10, %v1410_v29 }
 0x59a   :  { %v234_v24 = vpop.f32.mrf.mxu1 }
 0x59b   :  { %v366_v12 = vadd.f32 %v365_v11, %v1415_v33  ;;  %v235_v25 = vadd.f32 %v1408_v27, %v234_v24 }
 0x59d   :  { %369 = vrot.lane.b32.xlu2 %v366_v12, %s1289_s2  ;;  %v367_v16 = vmul.f32 %v366_v12, %v325_v60 }
 0x5f7   :  { %v370_v13 = vpop.permute.xlu2 %369 }
 0x5f8   :  { %v372_v14 = vmul.f32 %v370_v13, %v366_v12 }
 0x5fa   :  { %374 = vrot.lane.b32.xlu1 %v372_v14, %s1291_s22 }
 0x66c   :  { %v375_v18 = vpop.permute.xlu1 %374 }
 0x66d   :  { %v377_v19 = vadd.f32 %v375_v18, %v367_v16 }
 0x66f   :  { %1228 = vtanh.f32 %v377_v19 }
 0x675   :  { %v1229_v20 = vpop.eup %1228 }
 0x676   :  { %380 = vrot.lane.b32.xlu2 %v1229_v20, %s1289_s2 }
 0x67e   :  { %58 = vperm.xlu2 %1213, %v39_v37  }
 0x6d0   :  { %v381_v21 = vpop.permute.xlu2 %380 }
 0x6d1   :  { %v383_v22 = vmul.f32 %v381_v21, %v366_v12 }
 0x6d3   :  { %385 = vrot.lane.b32.xlu0 %v383_v22, %s1291_s22 }
 0x745   :  { %v386_v23 = vpop.permute.xlu0 %385 }
 0x746   :  { %389 = vst.msk [vmem:[#allocation3 + $0x10] sm:$0xff] %vm183_vm5, %v386_v23  ;;  %1184 = vmatmul.msk.f32.vlgmr.msra.gmra.mxu2 %vm183_vm5, %v386_v23 }
 0x747   :  { %614 = vmatpush.msra.mxu2 %v1425_v40 }
 0x749   :  { %615 = vmatpush.msra.mxu2 %v1430_v41 }
 0x74b   :  { %616 = vmatpush.msra.mxu2 %v1437_v42  ;;  %v59_v42 = vpop.permute.xlu2 %58 }
 0x74c   :  { %vm73_vm10 = vcmp.eq.s32.totalorder %v1386_v15, %v59_v42 }
 0x74d   :  { %617 = vmatpush.msra.mxu2 %v1444_v43  ;;  %v1161_v43 = vsel %vm73_vm10, 1.0, %v1287_v17  ;;  %v652_v37 = vld [vmem:[#allocation3 + $0x10] sm:$0xff] }
 0x74e   :  { %1170 = vmatmul.msk.f32.gmra.mxu0 %vm100_vm1, %v1161_v43 }
 0x7c9   :  { %v411_v26 = vpop.f32.mrf.mxu2 }
 0x7ca   :  { %v414_v28 = vadd.f32 %v411_v26, %v235_v25 }
 0x7cb   :  { %v158_v46 = vpop.f32.mrf.mxu0 }
 0x7cc   :  { %v415_v30 = vmul.f32 %v414_v28, %v1410_v29  ;;  %1178 = vmatmul.msk.f32.gmra.mxu1 %vm183_vm5, %v158_v46  ;;  %v661_v28 = vld [vmem:[%s1752_s5 + $0x18] sm:$0xff]  ;;  %v1574_v46 = vld [vmem:[%s1753_s7] ss:$0 sm:$0xff] }
 0x7ce   :  { %1230 = vtanh.f32 %v415_v30  ;;  %v660_v30 = vld [vmem:[%s1752_s5 + $0x10] sm:$0xff] }
 0x7d4   :  { %v1231_v31 = vpop.eup %1230 }
 0x7d5   :  { %v417_v32 = vmul.f32 %v1231_v31, %v1410_v29  ;;  %v659_v31 = vld [vmem:[%s1752_s5 + $0x8] sm:$0xff] }
 0x7d7   :  { %v418_v34 = vadd.f32 %v417_v32, %v1415_v33  ;;  %v658_v32 = vld [vmem:[%s1752_s5] sm:$0xff] }
 0x7d9   :  { %421 = vrot.lane.b32.xlu1 %v418_v34, %s1289_s2  ;;  %v419_v38 = vmul.f32 %v418_v34, %v377_v19 }
 0x849   :  { %v237_v48 = vpop.f32.mrf.mxu1 }
 0x84a   :  { %v238_v49 = vadd.f32 %v1408_v27, %v237_v48 }
 0x84b   :  { %v422_v35 = vpop.permute.xlu1 %421 }
 0x84c   :  { %v424_v36 = vmul.f32 %v422_v35, %v418_v34  ;;  %v650_v35 = vld [vmem:[#allocation3] sm:$0xff] }
 0x84e   :  { %426 = vrot.lane.b32.xlu0 %v424_v36, %s1291_s22  ;;  %v651_v36 = vld [vmem:[#allocation3 + $0x8] sm:$0xff] }
 0x8c0   :  { %v427_v39 = vpop.permute.xlu0 %426 }
 0x8c1   :  { %v429_v40 = vadd.f32 %v427_v39, %v419_v38 }
 0x8c3   :  { %1232 = vtanh.f32 %v429_v40 }
 0x8c9   :  { %v1233_v41 = vpop.eup %1232 }
 0x8ca   :  { %432 = vrot.lane.b32.xlu1 %v1233_v41, %s1289_s2 }
 0x8d2   :  { %61 = vperm.xlu1 %1214, %v40_v58  }
 0x93c   :  { %v433_v44 = vpop.permute.xlu1 %432 }
 0x93d   :  { %v435_v45 = vmul.f32 %v433_v44, %v418_v34 }
 0x93f   :  { %437 = vrot.lane.b32.xlu2 %v435_v45, %s1291_s22 }
 0x944   :  { %v62_v0 = vpop.permute.xlu1 %61 }
 0x945   :  { %vm74_vm11 = vcmp.eq.s32.totalorder %v1386_v15, %v62_v0 }
 0x946   :  { %v1162_v1 = vsel %vm74_vm11, 1.0, %v1287_v17 }
 0x947   :  { %1171 = vmatmul.msk.f32.gmra.mxu0 %vm100_vm1, %v1162_v1 }
 0x999   :  { %v438_v47 = vpop.permute.xlu2 %437 }
 0x99a   :  { %441 = vst.msk [vmem:[#allocation3 + $0x18] sm:$0xff] %vm183_vm5, %v438_v47  ;;  %1185 = vmatmul.msk.f32.vlgmr.msra.gmra.mxu3 %vm183_vm5, %v438_v47 }
 0x99b   :  { %702 = vmatpush.msra.mxu3 %v661_v28 }
 0x99d   :  { %703 = vmatpush.msra.mxu3 %v660_v30 }
 0x99f   :  { %704 = vmatpush.msra.mxu3 %v659_v31 }
 0x9a1   :  { %705 = vmatpush.msra.mxu3 %v658_v32  ;;  %v653_v38 = vld [vmem:[#allocation3 + $0x18] sm:$0xff] }
 0x9c4   :  { %v161_v6 = vpop.f32.mrf.mxu0 }
 0x9c5   :  { %1179 = vmatmul.msk.f32.gmra.mxu1 %vm183_vm5, %v161_v6  ;;  %v1601_v6 = vld [vmem:[%s1754_s6 + $0x10] sm:$0xff] }
 0xa1d   :  { %v463_v50 = vpop.f32.mrf.mxu3 }
 0xa1e   :  { %v466_v51 = vadd.f32 %v463_v50, %v238_v49 }
 0xa20   :  { %v467_v52 = vmul.f32 %v466_v51, %v1410_v29 }
 0xa22   :  { %1234 = vtanh.f32 %v467_v52 }
 0xa28   :  { %v1235_v53 = vpop.eup %1234 }
 0xa29   :  { %v469_v54 = vmul.f32 %v1235_v53, %v1410_v29 }
 0xa2b   :  { %v470_v55 = vadd.f32 %v469_v54, %v1415_v33 }
 0xa2d   :  { %473 = vrot.lane.b32.xlu0 %v470_v55, %s1289_s2  ;;  %v471_v59 = vmul.f32 %v470_v55, %v429_v40 }
 0xa42   :  { %v240_v9 = vpop.f32.mrf.mxu1 }
 0xa43   :  { %v241_v10 = vadd.f32 %v1408_v27, %v240_v9 }
 0xa9f   :  { %v474_v56 = vpop.permute.xlu0 %473 }
 0xaa0   :  { %v476_v57 = vmul.f32 %v474_v56, %v470_v55 }
 0xaa2   :  { %478 = vrot.lane.b32.xlu2 %v476_v57, %s1291_s22 }
 0xafc   :  { %v479_v60 = vpop.permute.xlu2 %478 }
 0xafd   :  { %v481_v61 = vadd.f32 %v479_v60, %v471_v59 }
 0xaff   :  { %1236 = vtanh.f32 %v481_v61 }
 0xb05   :  { %v1237_v62 = vpop.eup %1236 }
 0xb06   :  { %484 = vrot.lane.b32.xlu0 %v1237_v62, %s1289_s2 }
 0xb0e   :  { %64 = vperm.xlu0 %1212, %v41_v63  }
 0xb78   :  { %v485_v2 = vpop.permute.xlu0 %484 }
 0xb79   :  { %v487_v3 = vmul.f32 %v485_v2, %v470_v55 }
 0xb7b   :  { %489 = vrot.lane.b32.xlu1 %v487_v3, %s1291_s22 }
 0xb80   :  { %v65_v4 = vpop.permute.xlu0 %64 }
 0xb81   :  { %vm75_vm12 = vcmp.eq.s32.totalorder %v1386_v15, %v65_v4 }
 0xb82   :  { %v1163_v5 = vsel %vm75_vm12, 1.0, %v1287_v17 }
 0xb83   :  { %1172 = vmatmul.msk.f32.gmra.mxu0 %vm100_vm1, %v1163_v5  ;;  %v1596_v5 = vld [vmem:[%s1754_s6 + $0x18] sm:$0xff] }
 0xb84   :  { %973 = vmatpush.msrb.mxu1 %v1596_v5  ;;  %1069 = vmatpush.msrb.mxu0 %v1596_v5 }
 0xb86   :  { %974 = vmatpush.msrb.mxu1 %v1601_v6  ;;  %1070 = vmatpush.msrb.mxu0 %v1601_v6 }
 0xbed   :  { %v490_v7 = vpop.permute.xlu1 %489 }
 0xbee   :  { %493 = vst.msk [vmem:[#allocation3 + $0x20] sm:$0xff] %vm183_vm5, %v490_v7  ;;  %1186 = vmatmul.msk.f32.vlgmr.msrb.gmra.mxu2 %vm183_vm5, %v490_v7  ;;  %v1608_v7 = vld [vmem:[%s1754_s6 + $0x8] sm:$0xff] }
 0xbef   :  { %777 = vmatpush.msrb.mxu2 %v1596_v5  ;;  %975 = vmatpush.msrb.mxu1 %v1608_v7 }
 0xbf0   :  { %1071 = vmatpush.msrb.mxu0 %v1608_v7 }
 0xbf1   :  { %778 = vmatpush.msrb.mxu2 %v1601_v6 }
 0xbf3   :  { %779 = vmatpush.msrb.mxu2 %v1608_v7 }
 0xbf5   :  { %v654_v39 = vld [vmem:[#allocation3 + $0x20] sm:$0xff] }
 0xc00   :  { %v164_v8 = vpop.f32.mrf.mxu0 }
 0xc01   :  { %1180 = vmatmul.msk.f32.gmra.mxu1 %vm183_vm5, %v164_v8  ;;  %v1616_v8 = vld [vmem:[%s1754_s6] sm:$0xff] }
 0xc02   :  { %780 = vmatpush.msrb.mxu2 %v1616_v8  ;;  %976 = vmatpush.msrb.mxu1 %v1616_v8 }
 0xc03   :  { %1072 = vmatpush.msrb.mxu0 %v1616_v8 }
 0xc71   :  { %v515_v11 = vpop.f32.mrf.mxu2 }
 0xc72   :  { %v518_v12 = vadd.f32 %v515_v11, %v241_v10 }
 0xc74   :  { %v519_v13 = vmul.f32 %v518_v12, %v1410_v29 }
 0xc76   :  { %1238 = vtanh.f32 %v519_v13 }
 0xc7c   :  { %v1239_v14 = vpop.eup %1238 }
 0xc7d   :  { %v521_v16 = vmul.f32 %v1239_v14, %v1410_v29 }
 0xc7e   :  { %v243_v41 = vpop.f32.mrf.mxu1 }
 0xc7f   :  { %v522_v18 = vadd.f32 %v521_v16, %v1415_v33  ;;  %v244_v42 = vadd.f32 %v1408_v27, %v243_v41 }
 0xc81   :  { %525 = vrot.lane.b32.xlu2 %v522_v18, %s1289_s2  ;;  %v523_v21 = vmul.f32 %v522_v18, %v481_v61 }
 0xcdb   :  { %v526_v19 = vpop.permute.xlu2 %525 }
 0xcdc   :  { %v528_v20 = vmul.f32 %v526_v19, %v522_v18 }
 0xcde   :  { %530 = vrot.lane.b32.xlu1 %v528_v20, %s1291_s22 }
 0xd50   :  { %v531_v22 = vpop.permute.xlu1 %530 }
 0xd51   :  { %v533_v23 = vadd.f32 %v531_v22, %v523_v21 }
 0xd53   :  { %1240 = vtanh.f32 %v533_v23 }
 0xd59   :  { %v1241_v24 = vpop.eup %1240 }
 0xd5a   :  { %536 = vrot.lane.b32.xlu2 %v1241_v24, %s1289_s2 }
 0xdb4   :  { %v537_v25 = vpop.permute.xlu2 %536 }
 0xdb5   :  { %v539_v26 = vmul.f32 %v537_v25, %v522_v18 }
 0xdb7   :  { %541 = vrot.lane.b32.xlu0 %v539_v26, %s1291_s22 }
 0xe29   :  { %v542_v34 = vpop.permute.xlu0 %541 }
 0xe2a   :  { %545 = vst.msk [vmem:[#allocation3 + $0x28] sm:$0xff] %vm183_vm5, %v542_v34  ;;  %1187 = vmatmul.msk.f32.vlgmr.msrb.gmra.mxu3 %vm183_vm5, %v542_v34 }
 0xe31   :  { %v655_v40 = vld [vmem:[#allocation3 + $0x28] sm:$0xff] }
 0xe32   :  { %1189 = vmatmul.msk.f32.vlgmr.msra.gmra.mxu3 %vm183_vm5, %v650_v35 }
 0xe3a   :  { %1190 = vmatmul.msk.f32.gmra.mxu3 %vm183_vm5, %v651_v36 }
 0xe42   :  { %1191 = vmatmul.msk.f32.gmra.mxu3 %vm183_vm5, %v652_v37 }
 0xe4a   :  { %1192 = vmatmul.msk.f32.gmra.mxu3 %vm183_vm5, %v653_v38 }
 0xe52   :  { %1193 = vmatmul.msk.f32.gmra.mxu3 %vm183_vm5, %v654_v39 }
 0xe5a   :  { %1194 = vmatmul.msk.f32.gmra.mxu3 %vm183_vm5, %v655_v40 }
 0xead   :  { %v567_v43 = vpop.f32.mrf.mxu3 }
 0xeae   :  { %v570_v44 = vadd.f32 %v567_v43, %v244_v42 }
 0xeb0   :  { %v571_v45 = vmul.f32 %v570_v44, %v1410_v29 }
 0xeb2   :  { %1242 = vtanh.f32 %v571_v45 }
 0xeb5   :  { %v707_v47 = vpop.f32.mrf.mxu3 }
 0xeb6   :  { %v708_v48 = vadd.f32 %v1574_v46, %v707_v47 }
 0xeb8   :  { %v1243_v49 = vpop.eup %1242  ;;  %v744_v50 = vmul.f32 %v708_v48, %v1410_v29 }
 0xeb9   :  { %v573_v51 = vmul.f32 %v1243_v49, %v1410_v29 }
 0xeba   :  { %1244 = vtanh.f32 %v744_v50 }
 0xebb   :  { %v574_v52 = vadd.f32 %v573_v51, %v1415_v33 }
 0xebd   :  { %577 = vrot.lane.b32.xlu1 %v574_v52, %s1289_s2  ;;  %v575_v61 = vmul.f32 %v574_v52, %v533_v23  ;;  %v710_v13 = vpop.f32.mrf.mxu3 }
 0xebe   :  { %v711_v14 = vadd.f32 %v1574_v46, %v710_v13 }
 0xec0   :  { %v1245_v53 = vpop.eup %1244 }
 0xec1   :  { %v746_v54 = vmul.f32 %v1245_v53, %v1410_v29 }
 0xec3   :  { %v747_v55 = vadd.f32 %v746_v54, %v1415_v33 }
 0xec5   :  { %749 = vrot.lane.b32.xlu0 %v747_v55, %s1289_s2  ;;  %v713_v36 = vpop.f32.mrf.mxu3 }
 0xec6   :  { %v714_v37 = vadd.f32 %v1574_v46, %v713_v36 }
 0xecd   :  { %v716_v54 = vpop.f32.mrf.mxu3 }
 0xed5   :  { %v719_v13 = vpop.f32.mrf.mxu3 }
 0xf2f   :  { %v578_v56 = vpop.permute.xlu1 %577 }
 0xf30   :  { %v580_v57 = vmul.f32 %v578_v56, %v574_v52 }
 0xf32   :  { %582 = vrot.lane.b32.xlu2 %v580_v57, %s1291_s22 }
 0xf37   :  { %v750_v58 = vpop.permute.xlu0 %749 }
 0xf38   :  { %v752_v59 = vmul.f32 %v750_v58, %v747_v55 }
 0xf3a   :  { %1246 = vtanh.f32 %v752_v59 }
 0xf40   :  { %v1247_v60 = vpop.eup %1246 }
 0xf41   :  { %755 = vrot.lane.b32.xlu2 %v1247_v60, %s1290_s4 }
 0xf8c   :  { %v583_v62 = vpop.permute.xlu2 %582 }
 0xf8d   :  { %v1586_v63 = vadd.f32 %v583_v62, %v575_v61 }
 0xf8f   :  { %1248 = vtanh.f32 %v1586_v63 }
 0xf95   :  { %v1249_v0 = vpop.eup %1248 }
 0xf96   :  { %588 = vrot.lane.b32.xlu1 %v1249_v0, %s1289_s2 }
 0xf9b   :  { %v756_v1 = vpop.permute.xlu2 %755 }
 0xf9c   :  { %v758_v2 = vmul.f32 %v756_v1, %v747_v55  ;;  %v717_v55 = vadd.f32 %v1574_v46, %v716_v54  ;;  %v42_v1 = vld [vmem:[%s1747_s0 + $0x38] sm:$0xff] }
 0xf9e   :  { %761 = vrot.lane.b32.xlu1 %v758_v2, %s1291_s22 }
0x1008   :  { %v589_v3 = vpop.permute.xlu1 %588 }
0x1009   :  { %v591_v4 = vmul.f32 %v589_v3, %v574_v52 }
0x100b   :  { %593 = vrot.lane.b32.xlu0 %v591_v4, %s1291_s22 }
0x1010   :  { %v762_v10 = vpop.permute.xlu1 %761 }
0x1013   :  { %791 = vrot.lane.b32.xlu0 %v752_v59, %s1291_s22 }
0x107d   :  { %v594_v9 = vpop.permute.xlu0 %593 }
0x107e   :  { %597 = vst.msk [vmem:[#allocation3 + $0x30] sm:$0xff] %vm183_vm5, %v594_v9  ;;  %1188 = vmatmul.msk.f32.vlgmr.msra.gmra.mxu2 %vm183_vm5, %v594_v9 }
0x107f   :  { %829 = vmatpush.msra.mxu2 %v1596_v5 }
0x1081   :  { %830 = vmatpush.msra.mxu2 %v1601_v6 }
0x1083   :  { %831 = vmatpush.msra.mxu2 %v1608_v7 }
0x1085   :  { %v656_v11 = vld [vmem:[#allocation3 + $0x30] sm:$0xff]  ;;  %832 = vmatpush.msra.mxu2 %v1616_v8  ;;  %v792_v25 = vpop.permute.xlu0 %791 }
0x1086   :  { %1195 = vmatmul.msk.f32.gmra.mxu3 %vm183_vm5, %v656_v11  ;;  %1197 = vmatmul.msk.f32.vlgmr.msrb.gmra.mxu2 %vm183_vm5, %v762_v10 }
0x1087   :  { %877 = vmatpush.msrb.mxu2 %v1596_v5 }
0x1089   :  { %878 = vmatpush.msrb.mxu2 %v1601_v6 }
0x108b   :  { %879 = vmatpush.msrb.mxu2 %v1608_v7 }
0x108d   :  { %880 = vmatpush.msrb.mxu2 %v1616_v8 }
0x1101   :  { %v1637_v12 = vpop.f32.mrf.mxu2 }
0x1109   :  { %v782_v16 = vpop.f32.mrf.mxu2 }
0x110a   :  { %v785_v18 = vadd.f32 %v782_v16, %v711_v14  ;;  %v720_v14 = vadd.f32 %v1574_v46, %v719_v13 }
0x110c   :  { %v786_v19 = vmul.f32 %v785_v18, %v1410_v29 }
0x110e   :  { %1250 = vtanh.f32 %v786_v19 }
0x1114   :  { %v1251_v20 = vpop.eup %1250 }
0x1115   :  { %v788_v21 = vmul.f32 %v1251_v20, %v1410_v29 }
0x1117   :  { %v789_v22 = vadd.f32 %v788_v21, %v1415_v33 }
0x1119   :  { %796 = vrot.lane.b32.xlu2 %v789_v22, %s1289_s2  ;;  %v794_v26 = vmul.f32 %v792_v25, %v789_v22 }
0x1173   :  { %v797_v23 = vpop.permute.xlu2 %796 }
0x1174   :  { %v799_v24 = vmul.f32 %v797_v23, %v789_v22 }
0x1176   :  { %801 = vrot.lane.b32.xlu1 %v799_v24, %s1291_s22 }
0x11e8   :  { %v802_v28 = vpop.permute.xlu1 %801 }
0x11e9   :  { %v804_v30 = vadd.f32 %v802_v28, %v794_v26 }
0x11eb   :  { %1252 = vtanh.f32 %v804_v30 }
0x11f1   :  { %v1253_v31 = vpop.eup %1252 }
0x11f2   :  { %807 = vrot.lane.b32.xlu2 %v1253_v31, %s1289_s2 }
0x124c   :  { %v808_v32 = vpop.permute.xlu2 %807 }
0x124d   :  { %v810_v34 = vmul.f32 %v808_v32, %v789_v22 }
0x124f   :  { %813 = vrot.lane.b32.xlu0 %v810_v34, %s1291_s22  ;;  %v722_v34 = vpop.f32.mrf.mxu3 }
0x12c1   :  { %v814_v35 = vpop.permute.xlu0 %813 }
0x12c2   :  { %1198 = vmatmul.msk.f32.vlgmr.msra.gmra.mxu2 %vm183_vm5, %v814_v35  ;;  %v723_v35 = vadd.f32 %v1574_v46, %v722_v34 }
0x12c3   :  { %925 = vmatpush.msra.mxu2 %v1596_v5 }
0x12c5   :  { %926 = vmatpush.msra.mxu2 %v1601_v6 }
0x12c7   :  { %927 = vmatpush.msra.mxu2 %v1608_v7 }
0x12c9   :  { %928 = vmatpush.msra.mxu2 %v1616_v8 }
0x1345   :  { %v834_v38 = vpop.f32.mrf.mxu2 }
0x1346   :  { %v837_v39 = vadd.f32 %v834_v38, %v714_v37 }
0x1348   :  { %v838_v40 = vmul.f32 %v837_v39, %v1410_v29 }
0x134a   :  { %1254 = vtanh.f32 %v838_v40 }
0x1350   :  { %v1255_v41 = vpop.eup %1254 }
0x1351   :  { %v840_v42 = vmul.f32 %v1255_v41, %v1410_v29 }
0x1353   :  { %v841_v43 = vadd.f32 %v840_v42, %v1415_v33 }
0x1355   :  { %844 = vrot.lane.b32.xlu1 %v841_v43, %s1289_s2  ;;  %v842_v47 = vmul.f32 %v841_v43, %v804_v30 }
0x13c7   :  { %v845_v44 = vpop.permute.xlu1 %844 }
0x13c8   :  { %v847_v45 = vmul.f32 %v845_v44, %v841_v43 }
0x13ca   :  { %849 = vrot.lane.b32.xlu2 %v847_v45, %s1291_s22 }
0x1424   :  { %v850_v48 = vpop.permute.xlu2 %849 }
0x1425   :  { %v852_v49 = vadd.f32 %v850_v48, %v842_v47 }
0x1427   :  { %1256 = vtanh.f32 %v852_v49 }
0x142d   :  { %v1257_v50 = vpop.eup %1256 }
0x142e   :  { %855 = vrot.lane.b32.xlu0 %v1257_v50, %s1289_s2 }
0x14a0   :  { %v856_v51 = vpop.permute.xlu0 %855 }
0x14a1   :  { %v858_v52 = vmul.f32 %v856_v51, %v841_v43 }
0x14a3   :  { %861 = vrot.lane.b32.xlu1 %v858_v52, %s1291_s22 }
0x1515   :  { %v862_v53 = vpop.permute.xlu1 %861 }
0x1516   :  { %1199 = vmatmul.msk.f32.vlgmr.msrb.gmra.mxu2 %vm183_vm5, %v862_v53 }
0x1517   :  { %1021 = vmatpush.msrb.mxu2 %v1596_v5 }
0x1519   :  { %1022 = vmatpush.msrb.mxu2 %v1601_v6 }
0x151b   :  { %1023 = vmatpush.msrb.mxu2 %v1608_v7 }
0x151d   :  { %1024 = vmatpush.msrb.mxu2 %v1616_v8 }
0x1599   :  { %v882_v56 = vpop.f32.mrf.mxu2 }
0x159a   :  { %v885_v57 = vadd.f32 %v882_v56, %v717_v55 }
0x159c   :  { %v886_v58 = vmul.f32 %v885_v57, %v1410_v29 }
0x159e   :  { %1258 = vtanh.f32 %v886_v58  ;;  %v725_v58 = vpop.f32.mrf.mxu3 }
0x15a4   :  { %v1259_v59 = vpop.eup %1258 }
0x15a5   :  { %v888_v60 = vmul.f32 %v1259_v59, %v1410_v29  ;;  %v726_v59 = vadd.f32 %v1574_v46, %v725_v58 }
0x15a7   :  { %v889_v61 = vadd.f32 %v888_v60, %v1415_v33 }
0x15a9   :  { %892 = vrot.lane.b32.xlu2 %v889_v61, %s1289_s2  ;;  %v890_v2 = vmul.f32 %v889_v61, %v852_v49 }
0x1603   :  { %v893_v62 = vpop.permute.xlu2 %892 }
0x1604   :  { %v895_v0 = vmul.f32 %v893_v62, %v889_v61 }
0x1606   :  { %897 = vrot.lane.b32.xlu0 %v895_v0, %s1291_s22 }
0x160e   :  { %67 = vperm.xlu0 %1212, %v42_v1  }
0x1678   :  { %v898_v3 = vpop.permute.xlu0 %897 }
0x1679   :  { %v900_v4 = vadd.f32 %v898_v3, %v890_v2 }
0x167b   :  { %1260 = vtanh.f32 %v900_v4 }
0x1680   :  { %v68_v5 = vpop.permute.xlu0 %67 }
0x1681   :  { %v1261_v6 = vpop.eup %1260  ;;  %vm76_vm13 = vcmp.eq.s32.totalorder %v1386_v15, %v68_v5 }
0x1682   :  { %v1164_v7 = vsel %vm76_vm13, 1.0, %v1287_v17  ;;  %903 = vrot.lane.b32.xlu1 %v1261_v6, %s1289_s2 }
0x1683   :  { %1173 = vmatmul.msk.f32.gmra.mxu0 %vm100_vm1, %v1164_v7  ;;  %vm1151_vm1 = vcmask 64512  }
0x16f4   :  { %v904_v8 = vpop.permute.xlu1 %903 }
0x16f5   :  { %v906_v9 = vmul.f32 %v904_v8, %v889_v61 }
0x16f7   :  { %909 = vrot.lane.b32.xlu2 %v906_v9, %s1291_s22 }
0x1700   :  { %v167_v10 = vpop.f32.mrf.mxu0 }
0x1701   :  { %1181 = vmatmul.msk.f32.gmra.mxu1 %vm183_vm5, %v167_v10 }
0x1751   :  { %v910_v11 = vpop.permute.xlu2 %909 }
0x1752   :  { %1200 = vmatmul.msk.f32.vlgmr.msra.gmra.mxu2 %vm183_vm5, %v910_v11 }
0x177e   :  { %v246_v32 = vpop.f32.mrf.mxu1 }
0x177f   :  { %v247_v42 = vadd.f32 %v1408_v27, %v246_v32 }
0x1781   :  { %v622_v43 = vadd.f32 %v1637_v12, %v247_v42 }
0x1783   :  { %v623_v44 = vmul.f32 %v622_v43, %v1410_v29 }
0x17d5   :  { %v930_v15 = vpop.f32.mrf.mxu2 }
0x17d6   :  { %v933_v16 = vadd.f32 %v930_v15, %v720_v14 }
0x17d8   :  { %v934_v17 = vmul.f32 %v933_v16, %v1410_v29 }
0x17da   :  { %1262 = vtanh.f32 %v934_v17 }
0x17e0   :  { %v1263_v18 = vpop.eup %1262 }
0x17e1   :  { %v936_v19 = vmul.f32 %v1263_v18, %v1410_v29 }
0x17e3   :  { %v937_v20 = vadd.f32 %v936_v19, %v1415_v33 }
0x17e5   :  { %940 = vrot.lane.b32.xlu1 %v937_v20, %s1289_s2  ;;  %v938_v23 = vmul.f32 %v937_v20, %v900_v4 }
0x1857   :  { %v941_v21 = vpop.permute.xlu1 %940 }
0x1858   :  { %v943_v22 = vmul.f32 %v941_v21, %v937_v20 }
0x185a   :  { %945 = vrot.lane.b32.xlu2 %v943_v22, %s1291_s22 }
0x18b4   :  { %v946_v24 = vpop.permute.xlu2 %945 }
0x18b5   :  { %v948_v25 = vadd.f32 %v946_v24, %v938_v23 }
0x18b7   :  { %1264 = vtanh.f32 %v948_v25 }
0x18bd   :  { %v1265_v26 = vpop.eup %1264 }
0x18be   :  { %951 = vrot.lane.b32.xlu0 %v1265_v26, %s1289_s2 }
0x1930   :  { %v952_v28 = vpop.permute.xlu0 %951 }
0x1931   :  { %v954_v30 = vmul.f32 %v952_v28, %v937_v20 }
0x1933   :  { %957 = vrot.lane.b32.xlu1 %v954_v30, %s1291_s22 }
0x19a5   :  { %v958_v31 = vpop.permute.xlu1 %957 }
0x19a6   :  { %1201 = vmatmul.msk.f32.vlgmr.msrb.gmra.mxu1 %vm183_vm5, %v958_v31 }
0x1a23   :  { %v978_v36 = vpop.f32.mrf.mxu1 }
0x1a24   :  { %v981_v37 = vadd.f32 %v978_v36, %v723_v35  ;;  %v1102_v36 = vld [vmem:[%s1756_s8 + $0x18] sm:$0xff] }
0x1a25   :  { %1124 = vmatpush.msra.mxu1 %v1102_v36 }
0x1a26   :  { %v982_v38 = vmul.f32 %v981_v37, %v1410_v29  ;;  %v1099_v37 = vld [vmem:[%s1756_s8] sm:$0xff] }
0x1a28   :  { %1266 = vtanh.f32 %v982_v38 }
0x1a29   :  { %1268 = vtanh.f32 %v623_v44 }
0x1a2e   :  { %v1267_v39 = vpop.eup %1266 }
0x1a2f   :  { %v984_v40 = vmul.f32 %v1267_v39, %v1410_v29  ;;  %v1269_v48 = vpop.eup %1268 }
0x1a30   :  { %v625_v49 = vmul.f32 %v1269_v48, %v1410_v29 }
0x1a31   :  { %v985_v41 = vadd.f32 %v984_v40, %v1415_v33 }
0x1a32   :  { %v626_v50 = vadd.f32 %v625_v49, %v1415_v33 }
0x1a33   :  { %988 = vrot.lane.b32.xlu2 %v985_v41, %s1289_s2  ;;  %v986_v51 = vmul.f32 %v985_v41, %v948_v25 }
0x1a34   :  { %v627_v2 = vmul.f32 %v626_v50, %v1586_v63 }
0x1a8d   :  { %v989_v45 = vpop.permute.xlu2 %988 }
0x1a8e   :  { %v991_v47 = vmul.f32 %v989_v45, %v985_v41 }
0x1a90   :  { %993 = vrot.lane.b32.xlu0 %v991_v47, %s1291_s22 }
0x1a98   :  { %629 = vrot.lane.b32.xlu0 %v626_v50, %s1289_s2 }
0x1b02   :  { %v994_v52 = vpop.permute.xlu0 %993 }
0x1b03   :  { %v996_v53 = vadd.f32 %v994_v52, %v986_v51 }
0x1b05   :  { %1270 = vtanh.f32 %v996_v53 }
0x1b0a   :  { %v630_v55 = vpop.permute.xlu0 %629 }
0x1b0b   :  { %v1271_v27 = vpop.eup %1270  ;;  %v632_v56 = vmul.f32 %v630_v55, %v626_v50 }
0x1b0c   :  { %999 = vrot.lane.b32.xlu1 %v1271_v27, %s1289_s2 }
0x1b7e   :  { %v1000_v12 = vpop.permute.xlu1 %999 }
0x1b7f   :  { %v1002_v54 = vmul.f32 %v1000_v12, %v985_v41  ;;  %v1217_v41 = vld [vmem:[%s1755_s9] ss:$0 sm:$0xff] }
0x1b81   :  { %1005 = vrot.lane.b32.xlu2 %v1002_v54, %s1291_s22 }
0x1b89   :  { %634 = vrot.lane.b32.xlu2 %v632_v56, %s1291_s22 }
0x1bdb   :  { %v1006_v57 = vpop.permute.xlu2 %1005 }
0x1bdc   :  { %1202 = vmatmul.msk.f32.vlgmr.msrb.gmra.mxu2 %vm183_vm5, %v1006_v57 }
0x1be3   :  { %v635_v0 = vpop.permute.xlu2 %634 }
0x1be4   :  { %v637_v4 = vadd.f32 %v635_v0, %v627_v2 }
0x1c5f   :  { %v1026_v60 = vpop.f32.mrf.mxu2 }
0x1c60   :  { %v1029_v61 = vadd.f32 %v1026_v60, %v726_v59 }
0x1c62   :  { %v1030_v62 = vmul.f32 %v1029_v61, %v1410_v29 }
0x1c64   :  { %1272 = vtanh.f32 %v1030_v62 }
0x1c65   :  { %1274 = vtanh.f32 %v637_v4 }
0x1c6a   :  { %v1273_v1 = vpop.eup %1272 }
0x1c6b   :  { %v1032_v3 = vmul.f32 %v1273_v1, %v1410_v29  ;;  %v1275_v6 = vpop.eup %1274 }
0x1c6d   :  { %v1033_v5 = vadd.f32 %v1032_v3, %v1415_v33 }
0x1c6f   :  { %1036 = vrot.lane.b32.xlu1 %v1033_v5, %s1289_s2  ;;  %v1034_v63 = vmul.f32 %v1033_v5, %v996_v53 }
0x1c77   :  { %640 = vrot.lane.b32.xlu1 %v1275_v6, %s1289_s2 }
0x1ce1   :  { %v1037_v7 = vpop.permute.xlu1 %1036 }
0x1ce2   :  { %v1039_v8 = vmul.f32 %v1037_v7, %v1033_v5 }
0x1ce4   :  { %1041 = vrot.lane.b32.xlu0 %v1039_v8, %s1291_s22 }
0x1ce9   :  { %v641_v9 = vpop.permute.xlu1 %640 }
0x1cea   :  { %v643_v10 = vmul.f32 %v641_v9, %v626_v50 }
0x1cec   :  { %645 = vrot.lane.b32.xlu0 %v643_v10, %s1291_s22 }
0x1d56   :  { %v1042_v11 = vpop.permute.xlu0 %1041 }
0x1d57   :  { %v1044_v13 = vadd.f32 %v1042_v11, %v1034_v63 }
0x1d59   :  { %1276 = vtanh.f32 %v1044_v13 }
0x1d5e   :  { %v646_v14 = vpop.permute.xlu0 %645 }
0x1d5f   :  { %v1277_v15 = vpop.eup %1276  ;;  %649 = vst.msk [vmem:[#allocation3 + $0x38] sm:$0xff] %vm183_vm5, %v646_v14 }
0x1d60   :  { %1047 = vrot.lane.b32.xlu2 %v1277_v15, %s1289_s2 }
0x1d66   :  { %v657_v16 = vld [vmem:[#allocation3 + $0x38] sm:$0xff] }
0x1d67   :  { %1196 = vmatmul.msk.f32.gmra.mxu3 %vm183_vm5, %v657_v16 }
0x1dba   :  { %v1048_v17 = vpop.permute.xlu2 %1047 }
0x1dbb   :  { %v1050_v18 = vmul.f32 %v1048_v17, %v1033_v5 }
0x1dbd   :  { %1053 = vrot.lane.b32.xlu1 %v1050_v18, %s1291_s22 }
0x1dea   :  { %v728_v20 = vpop.f32.mrf.mxu3 }
0x1deb   :  { %v729_v21 = vadd.f32 %v1574_v46, %v728_v20 }
0x1e2f   :  { %v1054_v19 = vpop.permute.xlu1 %1053 }
0x1e30   :  { %1203 = vmatmul.msk.f32.vlgmr.msrb.gmra.mxu0 %vm183_vm5, %v1054_v19 }
0x1ead   :  { %v1074_v22 = vpop.f32.mrf.mxu0 }
0x1eae   :  { %v1077_v23 = vadd.f32 %v1074_v22, %v729_v21 }
0x1eb0   :  { %v1078_v24 = vmul.f32 %v1077_v23, %v1410_v29 }
0x1eb2   :  { %1278 = vtanh.f32 %v1078_v24 }
0x1eb8   :  { %v1279_v25 = vpop.eup %1278 }
0x1eb9   :  { %v1080_v26 = vmul.f32 %v1279_v25, %v1410_v29  ;;  %v1101_v29 = vld [vmem:[%s1756_s8 + $0x10] sm:$0xff] }
0x1eba   :  { %1125 = vmatpush.msra.mxu1 %v1101_v29 }
0x1ebb   :  { %v1081_v28 = vadd.f32 %v1080_v26, %v1415_v33  ;;  %v1100_v33 = vld [vmem:[%s1756_s8 + $0x8] sm:$0xff] }
0x1ebc   :  { %1126 = vmatpush.msra.mxu1 %v1100_v33 }
0x1ebd   :  { %1084 = vrot.lane.b32.xlu2 %v1081_v28, %s1289_s2  ;;  %v1082_v32 = vmul.f32 %v1081_v28, %v1044_v13 }
0x1ebe   :  { %1127 = vmatpush.msra.mxu1 %v1099_v37 }
0x1f17   :  { %v1085_v30 = vpop.permute.xlu2 %1084 }
0x1f18   :  { %v1087_v31 = vmul.f32 %v1085_v30, %v1081_v28 }
0x1f1a   :  { %1089 = vrot.lane.b32.xlu0 %v1087_v31, %s1291_s22 }
0x1f8c   :  { %v1090_v34 = vpop.permute.xlu0 %1089 }
0x1f8d   :  { %v1092_v35 = vadd.f32 %v1090_v34, %v1082_v32 }
0x1f8f   :  { %1280 = vtanh.f32 %v1092_v35 }
0x1f95   :  { %v1281_v46 = vpop.eup %1280 }
0x1f96   :  { %1095 = vrot.lane.b32.xlu1 %v1281_v46, %s1289_s2 }
0x2008   :  { %v1096_v38 = vpop.permute.xlu1 %1095 }
0x2009   :  { %v1098_v39 = vmul.f32 %v1096_v38, %v1081_v28 }
0x200b   :  { %1108 = vrot.lane.b32.xlu2 %v1098_v39, %s1291_s22 }
0x2065   :  { %v1109_v40 = vpop.permute.xlu2 %1108 }
0x2066   :  { %1204 = vmatmul.msk.f32.vlgmr.msra.gmra.mxu1 %vm183_vm5, %v1109_v40 }
0x20e3   :  { %v1129_v42 = vpop.f32.mrf.mxu1 }
0x20e4   :  { %v1130_v43 = vadd.f32 %v1217_v41, %v1129_v42 }
0x20e6   :  { %v1205_v44 = vmul.f32 -1.442695, %v1130_v43 }
0x20e8   :  { %1282 = vpow2.f32 %v1205_v44 }
0x20ee   :  { %v1283_v45 = vpop.eup %1282 }
0x20ef   :  { %v1135_v47 = vadd.f32 1.0, %v1283_v45 }
0x20f1   :  { %1284 = vrcp.f32 %v1135_v47  ;;  %v1147_v51 = vand.u32 2147483648, %v1135_v47  ;;  %v1145_v53 = vand.u32 2147483647, %v1135_v47  ;;  %vm1141_vm15 = vweird.f32 %v1135_v47 }
0x20f3   :  { %v1148_v12 = vor.u32 1.1754944e-38, %v1147_v51  ;;  %vm1146_vm2 = vcmp.eq.f32.partialorder %v1145_v53, 8.507059e+37 }
0x20f7   :  { %v1285_v48 = vpop.eup %1284 }
0x20f8   :  { %v1137_v49 = vmul.f32 %v1285_v48, %v1135_v47  ;;  %vm1142_vm14 = vweird.f32 %v1285_v48 }
0x20f9   :  { %vm1143_vm0 = vmor %vm1141_vm15, %vm1142_vm14 }
0x20fa   :  { %v1138_v50 = vsub.f32 1.0, %v1137_v49 }
0x20fc   :  { %v1139_v52 = vmul.f32 %v1285_v48, %v1138_v50 }
0x20fe   :  { %v1140_v27 = vadd.f32 %v1285_v48, %v1139_v52 }
0x2100   :  { %v1144_v54 = vsel %vm1143_vm0, %v1285_v48, %v1140_v27 }
0x2101   :  { %v1149_v55 = vsel %vm1146_vm2, %v1148_v12, %v1144_v54 }
0x2102   :  { %1152 = vst.msk [vmem:[%s1757_s10] sm:$0xff] %vm1151_vm1, %v1149_v55 }

</bundles_post_ra>
